<compile_context>
chip_gen: v6e
topology: v6e:2x2x1
jax: 0.10.0
libtpu: 0.0.40
codegen_flags: <defaults>
</compile_context>

<pallas_src>
import math
import functools

import jax
import jax.numpy as jnp
from jax import lax
from jax.experimental import pallas as pl
from jax.experimental.pallas import tpu as pltpu


# ---------------------------------------------------------------------------
# Tiling configuration
# ---------------------------------------------------------------------------

TM = 256           # row tile for matmul-like kernels (multiple of 8)
TN = 256           # output-column tile (multiple of 128)
TK = 512           # reduction tile (multiple of 128)
TM_LN = 1024       # row tile for standalone LayerNorm
VMEM_LIMIT = 48 * 1024 * 1024   # fits v7x's 64 MiB physical VMEM with headroom
LN_EPS = 1e-5


def _pick_tile(dim, pref, align):
    """Largest tile <= pref that divides `dim` and is a multiple of `align`;
    falls back to the full dimension (always a legal BlockSpec block)."""
    if dim <= pref:
        return dim
    t = (pref // align) * align
    while t >= align:
        if dim % t == 0:
            return t
        t -= align
    return dim


def _row_tile(m):
    """Row tile + padded row count (pad M so tm=TM tiles divide it)."""
    if m > TM:
        return TM, ((m + TM - 1) // TM) * TM
    return m, m


def _pad_rows(x, padded_rows):
    m = x.shape[0]
    if padded_rows == m:
        return x
    return jnp.pad(x, ((0, padded_rows - m),) + ((0, 0),) * (x.ndim - 1))


# ---------------------------------------------------------------------------
# Pallas kernels
# ---------------------------------------------------------------------------

def _ln_matmul_kernel(x_ref, g_ref, bln_ref, w_ref, b_ref, o_ref, *, eps, gelu):
    """Fused LayerNorm (f32) + matmul (+bias, optional QuickGELU)."""
    x = x_ref[...].astype(jnp.float32)                          # (tm, D)
    mean = jnp.mean(x, axis=-1, keepdims=True)
    var = jnp.mean(jnp.square(x - mean), axis=-1, keepdims=True)
    xn = (x - mean) * lax.rsqrt(var + eps)
    xn = xn * g_ref[...].astype(jnp.float32) + bln_ref[...].astype(jnp.float32)
    y = jnp.dot(xn.astype(w_ref.dtype), w_ref[...],
                preferred_element_type=jnp.float32)             # (tm, tn)
    y = y + b_ref[...].astype(jnp.float32)
    if gelu:
        # QuickGELU: x * sigmoid(1.702 * x), EUP sigmoid hides under MXU slot.
        y = y * jax.nn.sigmoid(1.702 * y)
    o_ref[...] = y.astype(o_ref.dtype)


def _matmul_kernel(x_ref, w_ref, b_ref, o_ref, acc_ref):
    """K-tiled matmul with f32 accumulator and fused bias."""
    @pl.when(pl.program_id(2) == 0)
    def _():
        acc_ref[...] = jnp.zeros_like(acc_ref)

    acc_ref[...] += jnp.dot(x_ref[...], w_ref[...],
                            preferred_element_type=jnp.float32)

    @pl.when(pl.program_id(2) == pl.num_programs(2) - 1)
    def _():
        o_ref[...] = (acc_ref[...] + b_ref[...].astype(jnp.float32)
                      ).astype(o_ref.dtype)


def _matmul_res_kernel(x_ref, w_ref, b_ref, r_ref, o_ref, acc_ref):
    """K-tiled matmul with f32 accumulator, fused bias and residual add."""
    @pl.when(pl.program_id(2) == 0)
    def _():
        acc_ref[...] = jnp.zeros_like(acc_ref)

    acc_ref[...] += jnp.dot(x_ref[...], w_ref[...],
                            preferred_element_type=jnp.float32)

    @pl.when(pl.program_id(2) == pl.num_programs(2) - 1)
    def _():
        y = (acc_ref[...] + b_ref[...].astype(jnp.float32)
             + r_ref[...].astype(jnp.float32))
        o_ref[...] = y.astype(o_ref.dtype)


def _layernorm_kernel(x_ref, g_ref, b_ref, o_ref, *, eps):
    x = x_ref[...].astype(jnp.float32)
    mean = jnp.mean(x, axis=-1, keepdims=True)
    var = jnp.mean(jnp.square(x - mean), axis=-1, keepdims=True)
    y = (x - mean) * lax.rsqrt(var + eps)
    y = y * g_ref[...].astype(jnp.float32) + b_ref[...].astype(jnp.float32)
    o_ref[...] = y.astype(o_ref.dtype)


def _attention_kernel(q_ref, k_ref, v_ref, o_ref, *, scale):
    """Softmax attention for a group of G heads per grid step.
    K is consumed as (G, L, Dh); the contraction on Dh happens on the MXU
    (no host-side transpose)."""
    q = q_ref[...].astype(jnp.float32) * scale                   # (G, L, Dh)
    k = k_ref[...].astype(jnp.float32)                           # (G, L, Dh)
    s = lax.dot_general(q, k, (((2,), (2,)), ((0,), (0,))),
                        preferred_element_type=jnp.float32)      # (G, L, L)
    s = s - jnp.max(s, axis=-1, keepdims=True)
    p = jnp.exp(s)
    p = p * pl.reciprocal(jnp.sum(p, axis=-1, keepdims=True), approx=True)
    o = lax.dot_general(p.astype(v_ref.dtype), v_ref[...],
                        (((2,), (1,)), ((0,), (0,))),
                        preferred_element_type=jnp.float32)      # (G, L, Dh)
    o_ref[...] = o.astype(o_ref.dtype)


# ---------------------------------------------------------------------------
# Pallas wrappers
# ---------------------------------------------------------------------------

def pallas_ln_matmul(x2d, gamma, beta, w, b, *, gelu=False):
    """LayerNorm(x) @ w + b (+QuickGELU). Tiled over (M, N); K = full D so
    the per-row LN statistics are available inside the kernel."""
    M, D = x2d.shape
    N = w.shape[1]
    tm, Mp = _row_tile(M)
    xp = _pad_rows(x2d, Mp)
    tn = _pick_tile(N, TN, 128)
    grid = (Mp // tm, N // tn)

    out = pl.pallas_call(
        functools.partial(_ln_matmul_kernel, eps=LN_EPS, gelu=gelu),
        out_shape=jax.ShapeDtypeStruct((Mp, N), x2d.dtype),
        grid=grid,
        in_specs=[
            pl.BlockSpec((tm, D), lambda i, j: (i, 0)),
            pl.BlockSpec((1, D), lambda i, j: (0, 0)),
            pl.BlockSpec((1, D), lambda i, j: (0, 0)),
            pl.BlockSpec((D, tn), lambda i, j: (0, j)),
            pl.BlockSpec((1, tn), lambda i, j: (0, j)),
        ],
        out_specs=pl.BlockSpec((tm, tn), lambda i, j: (i, j)),
        compiler_params=pltpu.CompilerParams(
            dimension_semantics=("parallel", "parallel"),
            vmem_limit_bytes=VMEM_LIMIT),
    )(xp, gamma.reshape(1, D), beta.reshape(1, D), w, b.reshape(1, N))
    return out[:M] if Mp != M else out


def pallas_matmul(x2d, w, b, residual=None):
    """x @ w + b (+ residual), tiled over (M, N, K) with a VMEM accumulator."""
    M, K = x2d.shape
    N = w.shape[1]
    tm, Mp = _row_tile(M)
    xp = _pad_rows(x2d, Mp)
    tn = _pick_tile(N, TN, 128)
    tk = _pick_tile(K, TK, 128)
    grid = (Mp // tm, N // tn, K // tk)

    in_specs = [
        pl.BlockSpec((tm, tk), lambda i, j, k: (i, k)),
        pl.BlockSpec((tk, tn), lambda i, j, k: (k, j)),
        pl.BlockSpec((1, tn), lambda i, j, k: (0, j)),
    ]
    args = [xp, w, b.reshape(1, N)]
    if residual is not None:
        in_specs.append(pl.BlockSpec((tm, tn), lambda i, j, k: (i, j)))
        args.append(_pad_rows(residual, Mp))
        kernel = _matmul_res_kernel
    else:
        kernel = _matmul_kernel

    out = pl.pallas_call(
        kernel,
        out_shape=jax.ShapeDtypeStruct((Mp, N), x2d.dtype),
        grid=grid,
        in_specs=in_specs,
        out_specs=pl.BlockSpec((tm, tn), lambda i, j, k: (i, j)),
        scratch_shapes=[pltpu.VMEM((tm, tn), jnp.float32)],
        compiler_params=pltpu.CompilerParams(
            dimension_semantics=("parallel", "parallel", "arbitrary"),
            vmem_limit_bytes=VMEM_LIMIT),
    )(*args)
    return out[:M] if Mp != M else out


def pallas_layernorm(x2d, gamma, beta):
    """Standalone LayerNorm, tiled over rows (parallel grid axis)."""
    M, D = x2d.shape
    if M > TM_LN:
        tm = TM_LN
        Mp = ((M + tm - 1) // tm) * tm
    else:
        tm, Mp = M, M
    xp = _pad_rows(x2d, Mp)

    out = pl.pallas_call(
        functools.partial(_layernorm_kernel, eps=LN_EPS),
        out_shape=jax.ShapeDtypeStruct((Mp, D), x2d.dtype),
        grid=(Mp // tm,),
        in_specs=[pl.BlockSpec((tm, D), lambda i: (i, 0)),
                  pl.BlockSpec((1, D), lambda i: (0, 0)),
                  pl.BlockSpec((1, D), lambda i: (0, 0))],
        out_specs=pl.BlockSpec((tm, D), lambda i: (i, 0)),
        compiler_params=pltpu.CompilerParams(
            dimension_semantics=("parallel",),
            vmem_limit_bytes=VMEM_LIMIT),
    )(xp, gamma.reshape(1, D), beta.reshape(1, D))
    return out[:M] if Mp != M else out


def pallas_attention(qh, kh, vh):
    """qh/kh/vh: (B*H, L, Dh). Processes G heads per grid step."""
    BH, L, Dh = qh.shape
    scale = 1.0 / math.sqrt(Dh)
    G = 1
    for cand in (8, 4, 2, 1):
        if BH % cand == 0:
            G = cand
            break
    spec = pl.BlockSpec((G, L, Dh), lambda i: (i, 0, 0))
    return pl.pallas_call(
        functools.partial(_attention_kernel, scale=scale),
        out_shape=jax.ShapeDtypeStruct((BH, L, Dh), qh.dtype),
        grid=(BH // G,),
        in_specs=[spec, spec, spec],
        out_specs=spec,
        compiler_params=pltpu.CompilerParams(
            dimension_semantics=("parallel",),
            vmem_limit_bytes=VMEM_LIMIT),
    )(qh, kh, vh)


# ---------------------------------------------------------------------------
# Model (parameters + forward)
# ---------------------------------------------------------------------------

def init_params(key, *, input_resolution, patch_size, width, layers, heads,
                output_dim):
    del heads
    scale = width ** (-0.5)
    n_patches = (input_resolution // patch_size) ** 2

    keys = jax.random.split(key, 8 + layers)
    p = {}
    p['conv_w'] = 0.02 * jax.random.normal(
        keys[0], (3 * patch_size * patch_size, width), jnp.float32)
    p['cls'] = scale * jax.random.normal(keys[1], (width,), jnp.float32)
    p['pos'] = scale * jax.random.normal(
        keys[2], (n_patches + 1, width), jnp.float32)
    p['ln_pre_w'] = jnp.ones((width,), jnp.float32)
    p['ln_pre_b'] = jnp.zeros((width,), jnp.float32)
    p['ln_post_w'] = jnp.ones((width,), jnp.float32)
    p['ln_post_b'] = jnp.zeros((width,), jnp.float32)
    p['proj'] = scale * jax.random.normal(
        keys[3], (width, output_dim), jnp.float32)

    p['layers'] = []
    for li in range(layers):
        lk = jax.random.split(keys[8 + li], 8)
        lp = {
            'ln1_w': jnp.ones((width,), jnp.float32),
            'ln1_b': jnp.zeros((width,), jnp.float32),
            'ln2_w': jnp.ones((width,), jnp.float32),
            'ln2_b': jnp.zeros((width,), jnp.float32),
            # fused Q|K|V projection (D, 3D)
            'w_qkv': 0.02 * jax.random.normal(lk[0], (width, 3 * width), jnp.float32),
            'b_qkv': 0.02 * jax.random.normal(lk[1], (3 * width,), jnp.float32),
            'wo': 0.02 * jax.random.normal(lk[2], (width, width), jnp.float32),
            'bo': 0.02 * jax.random.normal(lk[3], (width,), jnp.float32),
            'w1': 0.02 * jax.random.normal(lk[4], (width, 4 * width), jnp.float32),
            'b1': 0.02 * jax.random.normal(lk[5], (4 * width,), jnp.float32),
            'w2': 0.02 * jax.random.normal(lk[6], (4 * width, width), jnp.float32),
            'b2': 0.02 * jax.random.normal(lk[7], (width,), jnp.float32),
        }
        p['layers'].append(lp)
    return p


def residual_attention_block(x, lp, heads):
    # x: (L, B, D) — same sequence-first layout as the PyTorch block.
    L, B, D = x.shape
    Dh = D // heads
    x2 = x.reshape(L * B, D)

    # --- attention branch: fused LN + QKV projection ---
    qkv = pallas_ln_matmul(x2, lp['ln1_w'], lp['ln1_b'],
                           lp['w_qkv'], lp['b_qkv'])              # (L*B, 3D)
    q, k, v = qkv[:, :D], qkv[:, D:2 * D], qkv[:, 2 * D:]

    def to_heads(t):
        # (L*B, D) -> (L, B*H, Dh) -> (B*H, L, Dh)   (matches nn.MultiheadAttention)
        return t.reshape(L, B * heads, Dh).transpose(1, 0, 2)

    oh = pallas_attention(to_heads(q), to_heads(k), to_heads(v))  # (B*H, L, Dh)
    o = oh.transpose(1, 0, 2).reshape(L * B, D)
    # output projection + bias + residual fused in one kernel
    x2 = pallas_matmul(o, lp['wo'], lp['bo'], residual=x2)
    # TODO(synk): x = x + vim_att(ln_1(x), task_name) skipped (ViM undefined).

    # --- MLP branch: fused LN + up-proj + QuickGELU, then down-proj + residual ---
    h = pallas_ln_matmul(x2, lp['ln2_w'], lp['ln2_b'],
                         lp['w1'], lp['b1'], gelu=True)           # (L*B, 4D)
    x2 = pallas_matmul(h, lp['w2'], lp['b2'], residual=x2)
    # TODO(synk): x = x + vim_mlp(ln_2(x), task_name) skipped (ViM undefined).

    return x2.reshape(L, B, D)


def vision_transformer_forward(x_img, params, *, patch_size, width, heads,
                               output_dim):
    B, C, H, W = x_img.shape
    Pp = H // patch_size                       # patches per side
    N = Pp * Pp

    # conv1 as im2col + tiled Pallas matmul (stride == kernel == patch, no bias)
    patches = x_img.reshape(B, C, Pp, patch_size, Pp, patch_size)
    patches = patches.transpose(0, 2, 4, 1, 3, 5).reshape(
        B * N, C * patch_size * patch_size)
    zero_b = jnp.zeros((width,), x_img.dtype)
    patch_emb = pallas_matmul(patches, params['conv_w'], zero_b)  # (B*N, width)

    x = patch_emb.reshape(B, N, width)
    cls = jnp.broadcast_to(params['cls'].reshape(1, 1, width), (B, 1, width))
    x = jnp.concatenate([cls, x], axis=1)                     # (B, L, width)
    x = x + params['pos']                                     # + pos embedding
    L = x.shape[1]

    x2 = pallas_layernorm(x.reshape(B * L, width),
                          params['ln_pre_w'], params['ln_pre_b'])
    x = x2.reshape(B, L, width).transpose(1, 0, 2)            # (L, B, D)

    features = []
    for lp in params['layers']:
        x = residual_attention_block(x, lp, heads)
        features.append(x)

    xf = features[-1].transpose(1, 0, 2)                      # (B, L, D)
    # fused ln_post + projection on the cls token
    zero_proj_b = jnp.zeros((output_dim,), x_img.dtype)
    final_feat = pallas_ln_matmul(xf[:, 0, :],
                                  params['ln_post_w'], params['ln_post_b'],
                                  params['proj'], zero_proj_b)

    outputs = []
    for f in features:
        # (L, B, D) -> drop cls -> (B, D, N) -> (B, D, Pp, Pp)
        outputs.append(f[1:].transpose(1, 2, 0).reshape(B, width, Pp, Pp))
    outputs.append(final_feat)
    return outputs


# ---------------------------------------------------------------------------
# Main
# ---------------------------------------------------------------------------

if __name__ == "__main__":
    # Small shapes consistent with the module.
    input_resolution = 16
    patch_size = 8
    width = 32
    layers = 2
    heads = 4
    output_dim = 16
    batch = 2

    key = jax.random.PRNGKey(0)
    k_img, k_par = jax.random.split(key)
    x_img = jax.random.normal(
        k_img, (batch, 3, input_resolution, input_resolution), jnp.float32)

    params = init_params(k_par,
                         input_resolution=input_resolution,
                         patch_size=patch_size,
                         width=width,
                         layers=layers,
                         heads=heads,
                         output_dim=output_dim)

    fwd = jax.jit(functools.partial(
        vision_transformer_forward,
        patch_size=patch_size, width=width, heads=heads, output_dim=output_dim))

    outputs = fwd(x_img, params)
    outputs = jax.block_until_ready(outputs)

    # Sanity on output shapes (per-layer feature maps + final projected cls).
    Pp = input_resolution // patch_size
    assert all(o.shape == (batch, width, Pp, Pp) for o in outputs[:-1])
    assert outputs[-1].shape == (batch, output_dim)
    assert all(bool(jnp.all(jnp.isfinite(o))) for o in outputs)
    print("KERNEL_OK")
</pallas_src>

<mosaic_0001>
module attributes {stable_mosaic.version = 11 : i64} {
  func.func @_layernorm_kernel(%arg0: i32, %arg1: memref<10x32xf32, #tpu.memory_space<vmem>>, %arg2: memref<1x32xf32, #tpu.memory_space<vmem>>, %arg3: memref<1x32xf32, #tpu.memory_space<vmem>>, %arg4: memref<10x32xf32, #tpu.memory_space<vmem>>) attributes {dimension_semantics = [#tpu.dimension_semantics<parallel>], iteration_bounds = array<i64: 1>, scalar_prefetch = 0 : i64, scratch_operands = 0 : i64, tpu.core_type = #tpu.core_type<tc>, window_params = [{transform_indices = @transform_0, window_bounds = array<i64: 10, 32>}, {pipeline_mode = #tpu.pipeline_mode<synchronous>, transform_indices = @transform_1, window_bounds = array<i64: 1, 32>}, {pipeline_mode = #tpu.pipeline_mode<synchronous>, transform_indices = @transform_2, window_bounds = array<i64: 1, 32>}, {transform_indices = @transform_3, window_bounds = array<i64: 10, 32>}]} {
    %c0 = arith.constant 0 : index
    %c0_0 = arith.constant 0 : index
    %0 = vector.load %arg1[%c0, %c0_0] : memref<10x32xf32, #tpu.memory_space<vmem>>, vector<10x32xf32>
    %cst = arith.constant dense<0.000000e+00> : vector<10xf32>
    %1 = vector.multi_reduction <add>, %0, %cst [1] : vector<10x32xf32> to vector<10xf32>
    %2 = vector.shape_cast %1 : vector<10xf32> to vector<10x1xf32>
    %cst_1 = arith.constant 3.200000e+01 : f32
    %3 = vector.broadcast %cst_1 : f32 to vector<10x1xf32>
    %4 = arith.divf %2, %3 : vector<10x1xf32>
    %5 = vector.broadcast %4 : vector<10x1xf32> to vector<10x32xf32>
    %6 = arith.subf %0, %5 : vector<10x32xf32>
    %7 = arith.mulf %6, %6 : vector<10x32xf32>
    %cst_2 = arith.constant dense<0.000000e+00> : vector<10xf32>
    %8 = vector.multi_reduction <add>, %7, %cst_2 [1] : vector<10x32xf32> to vector<10xf32>
    %9 = vector.shape_cast %8 : vector<10xf32> to vector<10x1xf32>
    %cst_3 = arith.constant 3.200000e+01 : f32
    %10 = vector.broadcast %cst_3 : f32 to vector<10x1xf32>
    %11 = arith.divf %9, %10 : vector<10x1xf32>
    %12 = vector.broadcast %4 : vector<10x1xf32> to vector<10x32xf32>
    %13 = arith.subf %0, %12 : vector<10x32xf32>
    %cst_4 = arith.constant 9.99999974E-6 : f32
    %14 = vector.broadcast %cst_4 : f32 to vector<10x1xf32>
    %15 = arith.addf %11, %14 : vector<10x1xf32>
    %16 = math.rsqrt %15 : vector<10x1xf32>
    %17 = vector.broadcast %16 : vector<10x1xf32> to vector<10x32xf32>
    %18 = arith.mulf %13, %17 : vector<10x32xf32>
    %c0_5 = arith.constant 0 : index
    %c0_6 = arith.constant 0 : index
    %19 = vector.load %arg2[%c0_5, %c0_6] : memref<1x32xf32, #tpu.memory_space<vmem>>, vector<1x32xf32>
    %20 = vector.broadcast %19 : vector<1x32xf32> to vector<10x32xf32>
    %21 = arith.mulf %18, %20 : vector<10x32xf32>
    %c0_7 = arith.constant 0 : index
    %c0_8 = arith.constant 0 : index
    %22 = vector.load %arg3[%c0_7, %c0_8] : memref<1x32xf32, #tpu.memory_space<vmem>>, vector<1x32xf32>
    %23 = vector.broadcast %22 : vector<1x32xf32> to vector<10x32xf32>
    %24 = arith.addf %21, %23 : vector<10x32xf32>
    %c0_9 = arith.constant 0 : index
    %c0_10 = arith.constant 0 : index
    %25 = vector.load %arg4[%c0_9, %c0_10] : memref<10x32xf32, #tpu.memory_space<vmem>>, vector<10x32xf32>
    tpu.vector_store %arg4[%c0_9, %c0_10], %24 {strides = array<i32>} : memref<10x32xf32, #tpu.memory_space<vmem>>, vector<10x32xf32>,
    return
  }
  func.func @transform_0(%arg0: i32) -> (i32, i32) {
    %c0_i32 = arith.constant 0 : i32
    %c0_i32_0 = arith.constant 0 : i32
    return %arg0, %c0_i32 : i32, i32
  }
  func.func @transform_1(%arg0: i32) -> (i32, i32) {
    %c0_i32 = arith.constant 0 : i32
    %c0_i32_0 = arith.constant 0 : i32
    %c0_i32_1 = arith.constant 0 : i32
    return %c0_i32, %c0_i32_0 : i32, i32
  }
  func.func @transform_2(%arg0: i32) -> (i32, i32) {
    %c0_i32 = arith.constant 0 : i32
    %c0_i32_0 = arith.constant 0 : i32
    %c0_i32_1 = arith.constant 0 : i32
    return %c0_i32, %c0_i32_0 : i32, i32
  }
  func.func @transform_3(%arg0: i32) -> (i32, i32) {
    %c0_i32 = arith.constant 0 : i32
    %c0_i32_0 = arith.constant 0 : i32
    return %arg0, %c0_i32 : i32, i32
  }
}

module attributes {stable_mosaic.version = 11 : i64} {
  func.func @_matmul_kernel(%arg0: i32, %arg1: i32, %arg2: i32, %arg3: memref<8x192xf32, #tpu.memory_space<vmem>>, %arg4: memref<192x32xf32, #tpu.memory_space<vmem>>, %arg5: memref<1x32xf32, #tpu.memory_space<vmem>>, %arg6: memref<8x32xf32, #tpu.memory_space<vmem>>, %arg7: memref<8x32xf32, #tpu.memory_space<vmem>>) attributes {dimension_semantics = [#tpu.dimension_semantics<parallel>, #tpu.dimension_semantics<parallel>, #tpu.dimension_semantics<arbitrary>], iteration_bounds = array<i64: 1, 1, 1>, scalar_prefetch = 0 : i64, scratch_operands = 1 : i64, tpu.core_type = #tpu.core_type<tc>, window_params = [{transform_indices = @transform_0, window_bounds = array<i64: 8, 192>}, {transform_indices = @transform_1, window_bounds = array<i64: 192, 32>}, {transform_indices = @transform_2, window_bounds = array<i64: 1, 32>}, {transform_indices = @transform_3, window_bounds = array<i64: 8, 32>}]} {
    %c0_i32 = arith.constant 0 : i32
    %0 = arith.cmpi eq, %arg2, %c0_i32 : i32
    %1 = arith.extui %0 : i1 to i32
    %c0_i32_0 = arith.constant 0 : i32
    %2 = arith.cmpi ne, %1, %c0_i32_0 : i32
    scf.if %2 {
      %cst_10 = arith.constant 0.000000e+00 : f32
      %12 = vector.broadcast %cst_10 : f32 to vector<8x32xf32>
      %c0_11 = arith.constant 0 : index
      %c0_12 = arith.constant 0 : index
      %13 = vector.load %arg7[%c0_11, %c0_12] : memref<8x32xf32, #tpu.memory_space<vmem>>, vector<8x32xf32>
      tpu.vector_store %arg7[%c0_11, %c0_12], %12 {strides = array<i32>} : memref<8x32xf32, #tpu.memory_space<vmem>>, vector<8x32xf32>,
    } else {
    }
    %c0 = arith.constant 0 : index
    %c0_1 = arith.constant 0 : index
    %3 = vector.load %arg7[%c0, %c0_1] : memref<8x32xf32, #tpu.memory_space<vmem>>, vector<8x32xf32>
    %c0_2 = arith.constant 0 : index
    %c0_3 = arith.constant 0 : index
    %4 = vector.load %arg3[%c0_2, %c0_3] : memref<8x192xf32, #tpu.memory_space<vmem>>, vector<8x192xf32>
    %c0_4 = arith.constant 0 : index
    %c0_5 = arith.constant 0 : index
    %5 = vector.load %arg4[%c0_4, %c0_5] : memref<192x32xf32, #tpu.memory_space<vmem>>, vector<192x32xf32>
    %cst = arith.constant dense<0.000000e+00> : vector<8x32xf32>
    %6 = tpu.matmul %4, %5, %cst {dimension_numbers = #tpu.dot_dimension_numbers<[1], [0], [0], [1], [0, 0, 1, 1], [], []>} : vector<8x192xf32>, vector<192x32xf32>, vector<8x32xf32> -> vector<8x32xf32>
    %7 = arith.addf %3, %6 : vector<8x32xf32>
    %c0_6 = arith.constant 0 : index
    %c0_7 = arith.constant 0 : index
    %8 = vector.load %arg7[%c0_6, %c0_7] : memref<8x32xf32, #tpu.memory_space<vmem>>, vector<8x32xf32>
    tpu.vector_store %arg7[%c0_6, %c0_7], %7 {strides = array<i32>} : memref<8x32xf32, #tpu.memory_space<vmem>>, vector<8x32xf32>,
    %c0_i32_8 = arith.constant 0 : i32
    %9 = arith.cmpi eq, %arg2, %c0_i32_8 : i32
    %10 = arith.extui %9 : i1 to i32
    %c0_i32_9 = arith.constant 0 : i32
    %11 = arith.cmpi ne, %10, %c0_i32_9 : i32
    scf.if %11 {
      %c0_10 = arith.constant 0 : index
      %c0_11 = arith.constant 0 : index
      %12 = vector.load %arg7[%c0_10, %c0_11] : memref<8x32xf32, #tpu.memory_space<vmem>>, vector<8x32xf32>
      %c0_12 = arith.constant 0 : index
      %c0_13 = arith.constant 0 : index
      %13 = vector.load %arg5[%c0_12, %c0_13] : memref<1x32xf32, #tpu.memory_space<vmem>>, vector<1x32xf32>
      %14 = vector.broadcast %13 : vector<1x32xf32> to vector<8x32xf32>
      %15 = arith.addf %12, %14 : vector<8x32xf32>
      %c0_14 = arith.constant 0 : index
      %c0_15 = arith.constant 0 : index
      %16 = vector.load %arg6[%c0_14, %c0_15] : memref<8x32xf32, #tpu.memory_space<vmem>>, vector<8x32xf32>
      tpu.vector_store %arg6[%c0_14, %c0_15], %15 {strides = array<i32>} : memref<8x32xf32, #tpu.memory_space<vmem>>, vector<8x32xf32>,
    } else {
    }
    return
  }
  func.func @transform_0(%arg0: i32, %arg1: i32, %arg2: i32) -> (i32, i32) {
    %c0_i32 = arith.constant 0 : i32
    return %arg0, %arg2 : i32, i32
  }
  func.func @transform_1(%arg0: i32, %arg1: i32, %arg2: i32) -> (i32, i32) {
    %c0_i32 = arith.constant 0 : i32
    return %arg2, %arg1 : i32, i32
  }
  func.func @transform_2(%arg0: i32, %arg1: i32, %arg2: i32) -> (i32, i32) {
    %c0_i32 = arith.constant 0 : i32
    %c0_i32_0 = arith.constant 0 : i32
    return %c0_i32, %arg1 : i32, i32
  }
  func.func @transform_3(%arg0: i32, %arg1: i32, %arg2: i32) -> (i32, i32) {
    %c0_i32 = arith.constant 0 : i32
    return %arg0, %arg1 : i32, i32
  }
}

module attributes {stable_mosaic.version = 11 : i64} {
  func.func @_ln_matmul_kernel(%arg0: i32, %arg1: i32, %arg2: memref<10x32xf32, #tpu.memory_space<vmem>>, %arg3: memref<1x32xf32, #tpu.memory_space<vmem>>, %arg4: memref<1x32xf32, #tpu.memory_space<vmem>>, %arg5: memref<32x96xf32, #tpu.memory_space<vmem>>, %arg6: memref<1x96xf32, #tpu.memory_space<vmem>>, %arg7: memref<10x96xf32, #tpu.memory_space<vmem>>) attributes {dimension_semantics = [#tpu.dimension_semantics<parallel>, #tpu.dimension_semantics<parallel>], iteration_bounds = array<i64: 1, 1>, scalar_prefetch = 0 : i64, scratch_operands = 0 : i64, tpu.core_type = #tpu.core_type<tc>, window_params = [{transform_indices = @transform_0, window_bounds = array<i64: 10, 32>}, {pipeline_mode = #tpu.pipeline_mode<synchronous>, transform_indices = @transform_1, window_bounds = array<i64: 1, 32>}, {pipeline_mode = #tpu.pipeline_mode<synchronous>, transform_indices = @transform_2, window_bounds = array<i64: 1, 32>}, {transform_indices = @transform_3, window_bounds = array<i64: 32, 96>}, {transform_indices = @transform_4, window_bounds = array<i64: 1, 96>}, {transform_indices = @transform_5, window_bounds = array<i64: 10, 96>}]} {
    %c0 = arith.constant 0 : index
    %c0_0 = arith.constant 0 : index
    %0 = vector.load %arg2[%c0, %c0_0] : memref<10x32xf32, #tpu.memory_space<vmem>>, vector<10x32xf32>
    %cst = arith.constant dense<0.000000e+00> : vector<10xf32>
    %1 = vector.multi_reduction <add>, %0, %cst [1] : vector<10x32xf32> to vector<10xf32>
    %2 = vector.shape_cast %1 : vector<10xf32> to vector<10x1xf32>
    %cst_1 = arith.constant 3.200000e+01 : f32
    %3 = vector.broadcast %cst_1 : f32 to vector<10x1xf32>
    %4 = arith.divf %2, %3 : vector<10x1xf32>
    %5 = vector.broadcast %4 : vector<10x1xf32> to vector<10x32xf32>
    %6 = arith.subf %0, %5 : vector<10x32xf32>
    %7 = arith.mulf %6, %6 : vector<10x32xf32>
    %cst_2 = arith.constant dense<0.000000e+00> : vector<10xf32>
    %8 = vector.multi_reduction <add>, %7, %cst_2 [1] : vector<10x32xf32> to vector<10xf32>
    %9 = vector.shape_cast %8 : vector<10xf32> to vector<10x1xf32>
    %cst_3 = arith.constant 3.200000e+01 : f32
    %10 = vector.broadcast %cst_3 : f32 to vector<10x1xf32>
    %11 = arith.divf %9, %10 : vector<10x1xf32>
    %12 = vector.broadcast %4 : vector<10x1xf32> to vector<10x32xf32>
    %13 = arith.subf %0, %12 : vector<10x32xf32>
    %cst_4 = arith.constant 9.99999974E-6 : f32
    %14 = vector.broadcast %cst_4 : f32 to vector<10x1xf32>
    %15 = arith.addf %11, %14 : vector<10x1xf32>
    %16 = math.rsqrt %15 : vector<10x1xf32>
    %17 = vector.broadcast %16 : vector<10x1xf32> to vector<10x32xf32>
    %18 = arith.mulf %13, %17 : vector<10x32xf32>
    %c0_5 = arith.constant 0 : index
    %c0_6 = arith.constant 0 : index
    %19 = vector.load %arg3[%c0_5, %c0_6] : memref<1x32xf32, #tpu.memory_space<vmem>>, vector<1x32xf32>
    %20 = vector.broadcast %19 : vector<1x32xf32> to vector<10x32xf32>
    %21 = arith.mulf %18, %20 : vector<10x32xf32>
    %c0_7 = arith.constant 0 : index
    %c0_8 = arith.constant 0 : index
    %22 = vector.load %arg4[%c0_7, %c0_8] : memref<1x32xf32, #tpu.memory_space<vmem>>, vector<1x32xf32>
    %23 = vector.broadcast %22 : vector<1x32xf32> to vector<10x32xf32>
    %24 = arith.addf %21, %23 : vector<10x32xf32>
    %c0_9 = arith.constant 0 : index
    %c0_10 = arith.constant 0 : index
    %25 = vector.load %arg5[%c0_9, %c0_10] : memref<32x96xf32, #tpu.memory_space<vmem>>, vector<32x96xf32>
    %cst_11 = arith.constant dense<0.000000e+00> : vector<10x96xf32>
    %26 = tpu.matmul %24, %25, %cst_11 {dimension_numbers = #tpu.dot_dimension_numbers<[1], [0], [0], [1], [0, 0, 1, 1], [], []>} : vector<10x32xf32>, vector<32x96xf32>, vector<10x96xf32> -> vector<10x96xf32>
    %c0_12 = arith.constant 0 : index
    %c0_13 = arith.constant 0 : index
    %27 = vector.load %arg6[%c0_12, %c0_13] : memref<1x96xf32, #tpu.memory_space<vmem>>, vector<1x96xf32>
    %28 = vector.broadcast %27 : vector<1x96xf32> to vector<10x96xf32>
    %29 = arith.addf %26, %28 : vector<10x96xf32>
    %c0_14 = arith.constant 0 : index
    %c0_15 = arith.constant 0 : index
    %30 = vector.load %arg7[%c0_14, %c0_15] : memref<10x96xf32, #tpu.memory_space<vmem>>, vector<10x96xf32>
    tpu.vector_store %arg7[%c0_14, %c0_15], %29 {strides = array<i32>} : memref<10x96xf32, #tpu.memory_space<vmem>>, vector<10x96xf32>,
    return
  }
  func.func @transform_0(%arg0: i32, %arg1: i32) -> (i32, i32) {
    %c0_i32 = arith.constant 0 : i32
    %c0_i32_0 = arith.constant 0 : i32
    return %arg0, %c0_i32 : i32, i32
  }
  func.func @transform_1(%arg0: i32, %arg1: i32) -> (i32, i32) {
    %c0_i32 = arith.constant 0 : i32
    %c0_i32_0 = arith.constant 0 : i32
    %c0_i32_1 = arith.constant 0 : i32
    return %c0_i32, %c0_i32_0 : i32, i32
  }
  func.func @transform_2(%arg0: i32, %arg1: i32) -> (i32, i32) {
    %c0_i32 = arith.constant 0 : i32
    %c0_i32_0 = arith.constant 0 : i32
    %c0_i32_1 = arith.constant 0 : i32
    return %c0_i32, %c0_i32_0 : i32, i32
  }
  func.func @transform_3(%arg0: i32, %arg1: i32) -> (i32, i32) {
    %c0_i32 = arith.constant 0 : i32
    %c0_i32_0 = arith.constant 0 : i32
    return %c0_i32, %arg1 : i32, i32
  }
  func.func @transform_4(%arg0: i32, %arg1: i32) -> (i32, i32) {
    %c0_i32 = arith.constant 0 : i32
    %c0_i32_0 = arith.constant 0 : i32
    return %c0_i32, %arg1 : i32, i32
  }
  func.func @transform_5(%arg0: i32, %arg1: i32) -> (i32, i32) {
    %c0_i32 = arith.constant 0 : i32
    return %arg0, %arg1 : i32, i32
  }
}

module attributes {stable_mosaic.version = 11 : i64} {
  func.func @_attention_kernel(%arg0: i32, %arg1: memref<8x5x8xf32, #tpu.memory_space<vmem>>, %arg2: memref<8x5x8xf32, #tpu.memory_space<vmem>>, %arg3: memref<8x5x8xf32, #tpu.memory_space<vmem>>, %arg4: memref<8x5x8xf32, #tpu.memory_space<vmem>>) attributes {dimension_semantics = [#tpu.dimension_semantics<parallel>], iteration_bounds = array<i64: 1>, scalar_prefetch = 0 : i64, scratch_operands = 0 : i64, tpu.core_type = #tpu.core_type<tc>, window_params = [{transform_indices = @transform_0, window_bounds = array<i64: 8, 5, 8>}, {transform_indices = @transform_1, window_bounds = array<i64: 8, 5, 8>}, {transform_indices = @transform_2, window_bounds = array<i64: 8, 5, 8>}, {transform_indices = @transform_3, window_bounds = array<i64: 8, 5, 8>}]} {
    %c0 = arith.constant 0 : index
    %c0_0 = arith.constant 0 : index
    %c0_1 = arith.constant 0 : index
    %0 = vector.load %arg1[%c0, %c0_0, %c0_1] : memref<8x5x8xf32, #tpu.memory_space<vmem>>, vector<8x5x8xf32>
    %cst = arith.constant 0.353553385 : f32
    %1 = vector.broadcast %cst : f32 to vector<8x5x8xf32>
    %2 = arith.mulf %0, %1 : vector<8x5x8xf32>
    %c0_2 = arith.constant 0 : index
    %c0_3 = arith.constant 0 : index
    %c0_4 = arith.constant 0 : index
    %3 = vector.load %arg2[%c0_2, %c0_3, %c0_4] : memref<8x5x8xf32, #tpu.memory_space<vmem>>, vector<8x5x8xf32>
    %cst_5 = arith.constant dense<0.000000e+00> : vector<8x5x5xf32>
    %4 = tpu.matmul %2, %3, %cst_5 {dimension_numbers = #tpu.dot_dimension_numbers<[2], [2], [1], [1], [0, 0, 0, 1, 1, 1], [0], [0]>} : vector<8x5x8xf32>, vector<8x5x8xf32>, vector<8x5x5xf32> -> vector<8x5x5xf32>
    %cst_6 = arith.constant dense<0xFF800000> : vector<8x5xf32>
    %5 = vector.multi_reduction <maximumf>, %4, %cst_6 [2] : vector<8x5x5xf32> to vector<8x5xf32>
    %6 = vector.shape_cast %5 : vector<8x5xf32> to vector<8x5x1xf32>
    %7 = vector.broadcast %6 : vector<8x5x1xf32> to vector<8x5x5xf32>
    %8 = arith.subf %4, %7 : vector<8x5x5xf32>
    %9 = math.exp %8 : vector<8x5x5xf32>
    %cst_7 = arith.constant dense<0.000000e+00> : vector<8x5xf32>
    %10 = vector.multi_reduction <add>, %9, %cst_7 [2] : vector<8x5x5xf32> to vector<8x5xf32>
    %11 = vector.shape_cast %10 : vector<8x5xf32> to vector<8x5x1xf32>
    %12 = tpu.reciprocal %11 {approx = true} : vector<8x5x1xf32> -> vector<8x5x1xf32>
    %13 = vector.broadcast %12 : vector<8x5x1xf32> to vector<8x5x5xf32>
    %14 = arith.mulf %9, %13 : vector<8x5x5xf32>
    %c0_8 = arith.constant 0 : index
    %c0_9 = arith.constant 0 : index
    %c0_10 = arith.constant 0 : index
    %15 = vector.load %arg3[%c0_8, %c0_9, %c0_10] : memref<8x5x8xf32, #tpu.memory_space<vmem>>, vector<8x5x8xf32>
    %cst_11 = arith.constant dense<0.000000e+00> : vector<8x5x8xf32>
    %16 = tpu.matmul %14, %15, %cst_11 {dimension_numbers = #tpu.dot_dimension_numbers<[2], [1], [1], [2], [0, 0, 0, 1, 1, 2], [0], [0]>} : vector<8x5x5xf32>, vector<8x5x8xf32>, vector<8x5x8xf32> -> vector<8x5x8xf32>
    %c0_12 = arith.constant 0 : index
    %c0_13 = arith.constant 0 : index
    %c0_14 = arith.constant 0 : index
    %17 = vector.load %arg4[%c0_12, %c0_13, %c0_14] : memref<8x5x8xf32, #tpu.memory_space<vmem>>, vector<8x5x8xf32>
    tpu.vector_store %arg4[%c0_12, %c0_13, %c0_14], %16 {strides = array<i32>} : memref<8x5x8xf32, #tpu.memory_space<vmem>>, vector<8x5x8xf32>,
    return
  }
  func.func @transform_0(%arg0: i32) -> (i32, i32, i32) {
    %c0_i32 = arith.constant 0 : i32
    %c0_i32_0 = arith.constant 0 : i32
    %c0_i32_1 = arith.constant 0 : i32
    return %arg0, %c0_i32, %c0_i32_0 : i32, i32, i32
  }
  func.func @transform_1(%arg0: i32) -> (i32, i32, i32) {
    %c0_i32 = arith.constant 0 : i32
    %c0_i32_0 = arith.constant 0 : i32
    %c0_i32_1 = arith.constant 0 : i32
    return %arg0, %c0_i32, %c0_i32_0 : i32, i32, i32
  }
  func.func @transform_2(%arg0: i32) -> (i32, i32, i32) {
    %c0_i32 = arith.constant 0 : i32
    %c0_i32_0 = arith.constant 0 : i32
    %c0_i32_1 = arith.constant 0 : i32
    return %arg0, %c0_i32, %c0_i32_0 : i32, i32, i32
  }
  func.func @transform_3(%arg0: i32) -> (i32, i32, i32) {
    %c0_i32 = arith.constant 0 : i32
    %c0_i32_0 = arith.constant 0 : i32
    %c0_i32_1 = arith.constant 0 : i32
    return %arg0, %c0_i32, %c0_i32_0 : i32, i32, i32
  }
}

module attributes {stable_mosaic.version = 11 : i64} {
  func.func @_matmul_res_kernel(%arg0: i32, %arg1: i32, %arg2: i32, %arg3: memref<10x32xf32, #tpu.memory_space<vmem>>, %arg4: memref<32x32xf32, #tpu.memory_space<vmem>>, %arg5: memref<1x32xf32, #tpu.memory_space<vmem>>, %arg6: memref<10x32xf32, #tpu.memory_space<vmem>>, %arg7: memref<10x32xf32, #tpu.memory_space<vmem>>, %arg8: memref<10x32xf32, #tpu.memory_space<vmem>>) attributes {dimension_semantics = [#tpu.dimension_semantics<parallel>, #tpu.dimension_semantics<parallel>, #tpu.dimension_semantics<arbitrary>], iteration_bounds = array<i64: 1, 1, 1>, scalar_prefetch = 0 : i64, scratch_operands = 1 : i64, tpu.core_type = #tpu.core_type<tc>, window_params = [{transform_indices = @transform_0, window_bounds = array<i64: 10, 32>}, {transform_indices = @transform_1, window_bounds = array<i64: 32, 32>}, {transform_indices = @transform_2, window_bounds = array<i64: 1, 32>}, {transform_indices = @transform_3, window_bounds = array<i64: 10, 32>}, {transform_indices = @transform_4, window_bounds = array<i64: 10, 32>}]} {
    %c0_i32 = arith.constant 0 : i32
    %0 = arith.cmpi eq, %arg2, %c0_i32 : i32
    %1 = arith.extui %0 : i1 to i32
    %c0_i32_0 = arith.constant 0 : i32
    %2 = arith.cmpi ne, %1, %c0_i32_0 : i32
    scf.if %2 {
      %cst_10 = arith.constant 0.000000e+00 : f32
      %12 = vector.broadcast %cst_10 : f32 to vector<10x32xf32>
      %c0_11 = arith.constant 0 : index
      %c0_12 = arith.constant 0 : index
      %13 = vector.load %arg8[%c0_11, %c0_12] : memref<10x32xf32, #tpu.memory_space<vmem>>, vector<10x32xf32>
      tpu.vector_store %arg8[%c0_11, %c0_12], %12 {strides = array<i32>} : memref<10x32xf32, #tpu.memory_space<vmem>>, vector<10x32xf32>,
    } else {
    }
    %c0 = arith.constant 0 : index
    %c0_1 = arith.constant 0 : index
    %3 = vector.load %arg8[%c0, %c0_1] : memref<10x32xf32, #tpu.memory_space<vmem>>, vector<10x32xf32>
    %c0_2 = arith.constant 0 : index
    %c0_3 = arith.constant 0 : index
    %4 = vector.load %arg3[%c0_2, %c0_3] : memref<10x32xf32, #tpu.memory_space<vmem>>, vector<10x32xf32>
    %c0_4 = arith.constant 0 : index
    %c0_5 = arith.constant 0 : index
    %5 = vector.load %arg4[%c0_4, %c0_5] : memref<32x32xf32, #tpu.memory_space<vmem>>, vector<32x32xf32>
    %cst = arith.constant dense<0.000000e+00> : vector<10x32xf32>
    %6 = tpu.matmul %4, %5, %cst {dimension_numbers = #tpu.dot_dimension_numbers<[1], [0], [0], [1], [0, 0, 1, 1], [], []>} : vector<10x32xf32>, vector<32x32xf32>, vector<10x32xf32> -> vector<10x32xf32>
    %7 = arith.addf %3, %6 : vector<10x32xf32>
    %c0_6 = arith.constant 0 : index
    %c0_7 = arith.constant 0 : index
    %8 = vector.load %arg8[%c0_6, %c0_7] : memref<10x32xf32, #tpu.memory_space<vmem>>, vector<10x32xf32>
    tpu.vector_store %arg8[%c0_6, %c0_7], %7 {strides = array<i32>} : memref<10x32xf32, #tpu.memory_space<vmem>>, vector<10x32xf32>,
    %c0_i32_8 = arith.constant 0 : i32
    %9 = arith.cmpi eq, %arg2, %c0_i32_8 : i32
    %10 = arith.extui %9 : i1 to i32
    %c0_i32_9 = arith.constant 0 : i32
    %11 = arith.cmpi ne, %10, %c0_i32_9 : i32
    scf.if %11 {
      %c0_10 = arith.constant 0 : index
      %c0_11 = arith.constant 0 : index
      %12 = vector.load %arg8[%c0_10, %c0_11] : memref<10x32xf32, #tpu.memory_space<vmem>>, vector<10x32xf32>
      %c0_12 = arith.constant 0 : index
      %c0_13 = arith.constant 0 : index
      %13 = vector.load %arg5[%c0_12, %c0_13] : memref<1x32xf32, #tpu.memory_space<vmem>>, vector<1x32xf32>
      %14 = vector.broadcast %13 : vector<1x32xf32> to vector<10x32xf32>
      %15 = arith.addf %12, %14 : vector<10x32xf32>
      %c0_14 = arith.constant 0 : index
      %c0_15 = arith.constant 0 : index
      %16 = vector.load %arg6[%c0_14, %c0_15] : memref<10x32xf32, #tpu.memory_space<vmem>>, vector<10x32xf32>
      %17 = arith.addf %15, %16 : vector<10x32xf32>
      %c0_16 = arith.constant 0 : index
      %c0_17 = arith.constant 0 : index
      %18 = vector.load %arg7[%c0_16, %c0_17] : memref<10x32xf32, #tpu.memory_space<vmem>>, vector<10x32xf32>
      tpu.vector_store %arg7[%c0_16, %c0_17], %17 {strides = array<i32>} : memref<10x32xf32, #tpu.memory_space<vmem>>, vector<10x32xf32>,
    } else {
    }
    return
  }
  func.func @transform_0(%arg0: i32, %arg1: i32, %arg2: i32) -> (i32, i32) {
    %c0_i32 = arith.constant 0 : i32
    return %arg0, %arg2 : i32, i32
  }
  func.func @transform_1(%arg0: i32, %arg1: i32, %arg2: i32) -> (i32, i32) {
    %c0_i32 = arith.constant 0 : i32
    return %arg2, %arg1 : i32, i32
  }
  func.func @transform_2(%arg0: i32, %arg1: i32, %arg2: i32) -> (i32, i32) {
    %c0_i32 = arith.constant 0 : i32
    %c0_i32_0 = arith.constant 0 : i32
    return %c0_i32, %arg1 : i32, i32
  }
  func.func @transform_3(%arg0: i32, %arg1: i32, %arg2: i32) -> (i32, i32) {
    %c0_i32 = arith.constant 0 : i32
    return %arg0, %arg1 : i32, i32
  }
  func.func @transform_4(%arg0: i32, %arg1: i32, %arg2: i32) -> (i32, i32) {
    %c0_i32 = arith.constant 0 : i32
    return %arg0, %arg1 : i32, i32
  }
}

module attributes {stable_mosaic.version = 11 : i64} {
  func.func @_ln_matmul_kernel(%arg0: i32, %arg1: i32, %arg2: memref<10x32xf32, #tpu.memory_space<vmem>>, %arg3: memref<1x32xf32, #tpu.memory_space<vmem>>, %arg4: memref<1x32xf32, #tpu.memory_space<vmem>>, %arg5: memref<32x128xf32, #tpu.memory_space<vmem>>, %arg6: memref<1x128xf32, #tpu.memory_space<vmem>>, %arg7: memref<10x128xf32, #tpu.memory_space<vmem>>) attributes {dimension_semantics = [#tpu.dimension_semantics<parallel>, #tpu.dimension_semantics<parallel>], iteration_bounds = array<i64: 1, 1>, scalar_prefetch = 0 : i64, scratch_operands = 0 : i64, tpu.core_type = #tpu.core_type<tc>, window_params = [{transform_indices = @transform_0, window_bounds = array<i64: 10, 32>}, {pipeline_mode = #tpu.pipeline_mode<synchronous>, transform_indices = @transform_1, window_bounds = array<i64: 1, 32>}, {pipeline_mode = #tpu.pipeline_mode<synchronous>, transform_indices = @transform_2, window_bounds = array<i64: 1, 32>}, {transform_indices = @transform_3, window_bounds = array<i64: 32, 128>}, {transform_indices = @transform_4, window_bounds = array<i64: 1, 128>}, {transform_indices = @transform_5, window_bounds = array<i64: 10, 128>}]} {
    %c0 = arith.constant 0 : index
    %c0_0 = arith.constant 0 : index
    %0 = vector.load %arg2[%c0, %c0_0] : memref<10x32xf32, #tpu.memory_space<vmem>>, vector<10x32xf32>
    %cst = arith.constant dense<0.000000e+00> : vector<10xf32>
    %1 = vector.multi_reduction <add>, %0, %cst [1] : vector<10x32xf32> to vector<10xf32>
    %2 = vector.shape_cast %1 : vector<10xf32> to vector<10x1xf32>
    %cst_1 = arith.constant 3.200000e+01 : f32
    %3 = vector.broadcast %cst_1 : f32 to vector<10x1xf32>
    %4 = arith.divf %2, %3 : vector<10x1xf32>
    %5 = vector.broadcast %4 : vector<10x1xf32> to vector<10x32xf32>
    %6 = arith.subf %0, %5 : vector<10x32xf32>
    %7 = arith.mulf %6, %6 : vector<10x32xf32>
    %cst_2 = arith.constant dense<0.000000e+00> : vector<10xf32>
    %8 = vector.multi_reduction <add>, %7, %cst_2 [1] : vector<10x32xf32> to vector<10xf32>
    %9 = vector.shape_cast %8 : vector<10xf32> to vector<10x1xf32>
    %cst_3 = arith.constant 3.200000e+01 : f32
    %10 = vector.broadcast %cst_3 : f32 to vector<10x1xf32>
    %11 = arith.divf %9, %10 : vector<10x1xf32>
    %12 = vector.broadcast %4 : vector<10x1xf32> to vector<10x32xf32>
    %13 = arith.subf %0, %12 : vector<10x32xf32>
    %cst_4 = arith.constant 9.99999974E-6 : f32
    %14 = vector.broadcast %cst_4 : f32 to vector<10x1xf32>
    %15 = arith.addf %11, %14 : vector<10x1xf32>
    %16 = math.rsqrt %15 : vector<10x1xf32>
    %17 = vector.broadcast %16 : vector<10x1xf32> to vector<10x32xf32>
    %18 = arith.mulf %13, %17 : vector<10x32xf32>
    %c0_5 = arith.constant 0 : index
    %c0_6 = arith.constant 0 : index
    %19 = vector.load %arg3[%c0_5, %c0_6] : memref<1x32xf32, #tpu.memory_space<vmem>>, vector<1x32xf32>
    %20 = vector.broadcast %19 : vector<1x32xf32> to vector<10x32xf32>
    %21 = arith.mulf %18, %20 : vector<10x32xf32>
    %c0_7 = arith.constant 0 : index
    %c0_8 = arith.constant 0 : index
    %22 = vector.load %arg4[%c0_7, %c0_8] : memref<1x32xf32, #tpu.memory_space<vmem>>, vector<1x32xf32>
    %23 = vector.broadcast %22 : vector<1x32xf32> to vector<10x32xf32>
    %24 = arith.addf %21, %23 : vector<10x32xf32>
    %c0_9 = arith.constant 0 : index
    %c0_10 = arith.constant 0 : index
    %25 = vector.load %arg5[%c0_9, %c0_10] : memref<32x128xf32, #tpu.memory_space<vmem>>, vector<32x128xf32>
    %cst_11 = arith.constant dense<0.000000e+00> : vector<10x128xf32>
    %26 = tpu.matmul %24, %25, %cst_11 {dimension_numbers = #tpu.dot_dimension_numbers<[1], [0], [0], [1], [0, 0, 1, 1], [], []>} : vector<10x32xf32>, vector<32x128xf32>, vector<10x128xf32> -> vector<10x128xf32>
    %c0_12 = arith.constant 0 : index
    %c0_13 = arith.constant 0 : index
    %27 = vector.load %arg6[%c0_12, %c0_13] : memref<1x128xf32, #tpu.memory_space<vmem>>, vector<1x128xf32>
    %28 = vector.broadcast %27 : vector<1x128xf32> to vector<10x128xf32>
    %29 = arith.addf %26, %28 : vector<10x128xf32>
    %cst_14 = arith.constant 1.702000e+00 : f32
    %30 = vector.broadcast %cst_14 : f32 to vector<10x128xf32>
    %31 = arith.mulf %30, %29 : vector<10x128xf32>
    %32 = arith.negf %31 : vector<10x128xf32>
    %33 = math.exp %32 : vector<10x128xf32>
    %cst_15 = arith.constant 1.000000e+00 : f32
    %34 = vector.broadcast %cst_15 : f32 to vector<10x128xf32>
    %35 = arith.addf %34, %33 : vector<10x128xf32>
    %36 = arith.divf %34, %35 : vector<10x128xf32>
    %37 = arith.mulf %29, %36 : vector<10x128xf32>
    %c0_16 = arith.constant 0 : index
    %c0_17 = arith.constant 0 : index
    %38 = vector.load %arg7[%c0_16, %c0_17] : memref<10x128xf32, #tpu.memory_space<vmem>>, vector<10x128xf32>
    tpu.vector_store %arg7[%c0_16, %c0_17], %37 {strides = array<i32>} : memref<10x128xf32, #tpu.memory_space<vmem>>, vector<10x128xf32>,
    return
  }
  func.func @transform_0(%arg0: i32, %arg1: i32) -> (i32, i32) {
    %c0_i32 = arith.constant 0 : i32
    %c0_i32_0 = arith.constant 0 : i32
    return %arg0, %c0_i32 : i32, i32
  }
  func.func @transform_1(%arg0: i32, %arg1: i32) -> (i32, i32) {
    %c0_i32 = arith.constant 0 : i32
    %c0_i32_0 = arith.constant 0 : i32
    %c0_i32_1 = arith.constant 0 : i32
    return %c0_i32, %c0_i32_0 : i32, i32
  }
  func.func @transform_2(%arg0: i32, %arg1: i32) -> (i32, i32) {
    %c0_i32 = arith.constant 0 : i32
    %c0_i32_0 = arith.constant 0 : i32
    %c0_i32_1 = arith.constant 0 : i32
    return %c0_i32, %c0_i32_0 : i32, i32
  }
  func.func @transform_3(%arg0: i32, %arg1: i32) -> (i32, i32) {
    %c0_i32 = arith.constant 0 : i32
    %c0_i32_0 = arith.constant 0 : i32
    return %c0_i32, %arg1 : i32, i32
  }
  func.func @transform_4(%arg0: i32, %arg1: i32) -> (i32, i32) {
    %c0_i32 = arith.constant 0 : i32
    %c0_i32_0 = arith.constant 0 : i32
    return %c0_i32, %arg1 : i32, i32
  }
  func.func @transform_5(%arg0: i32, %arg1: i32) -> (i32, i32) {
    %c0_i32 = arith.constant 0 : i32
    return %arg0, %arg1 : i32, i32
  }
}

module attributes {stable_mosaic.version = 11 : i64} {
  func.func @_matmul_res_kernel(%arg0: i32, %arg1: i32, %arg2: i32, %arg3: memref<10x128xf32, #tpu.memory_space<vmem>>, %arg4: memref<128x32xf32, #tpu.memory_space<vmem>>, %arg5: memref<1x32xf32, #tpu.memory_space<vmem>>, %arg6: memref<10x32xf32, #tpu.memory_space<vmem>>, %arg7: memref<10x32xf32, #tpu.memory_space<vmem>>, %arg8: memref<10x32xf32, #tpu.memory_space<vmem>>) attributes {dimension_semantics = [#tpu.dimension_semantics<parallel>, #tpu.dimension_semantics<parallel>, #tpu.dimension_semantics<arbitrary>], iteration_bounds = array<i64: 1, 1, 1>, scalar_prefetch = 0 : i64, scratch_operands = 1 : i64, tpu.core_type = #tpu.core_type<tc>, window_params = [{transform_indices = @transform_0, window_bounds = array<i64: 10, 128>}, {transform_indices = @transform_1, window_bounds = array<i64: 128, 32>}, {transform_indices = @transform_2, window_bounds = array<i64: 1, 32>}, {transform_indices = @transform_3, window_bounds = array<i64: 10, 32>}, {transform_indices = @transform_4, window_bounds = array<i64: 10, 32>}]} {
    %c0_i32 = arith.constant 0 : i32
    %0 = arith.cmpi eq, %arg2, %c0_i32 : i32
    %1 = arith.extui %0 : i1 to i32
    %c0_i32_0 = arith.constant 0 : i32
    %2 = arith.cmpi ne, %1, %c0_i32_0 : i32
    scf.if %2 {
      %cst_10 = arith.constant 0.000000e+00 : f32
      %12 = vector.broadcast %cst_10 : f32 to vector<10x32xf32>
      %c0_11 = arith.constant 0 : index
      %c0_12 = arith.constant 0 : index
      %13 = vector.load %arg8[%c0_11, %c0_12] : memref<10x32xf32, #tpu.memory_space<vmem>>, vector<10x32xf32>
      tpu.vector_store %arg8[%c0_11, %c0_12], %12 {strides = array<i32>} : memref<10x32xf32, #tpu.memory_space<vmem>>, vector<10x32xf32>,
    } else {
    }
    %c0 = arith.constant 0 : index
    %c0_1 = arith.constant 0 : index
    %3 = vector.load %arg8[%c0, %c0_1] : memref<10x32xf32, #tpu.memory_space<vmem>>, vector<10x32xf32>
    %c0_2 = arith.constant 0 : index
    %c0_3 = arith.constant 0 : index
    %4 = vector.load %arg3[%c0_2, %c0_3] : memref<10x128xf32, #tpu.memory_space<vmem>>, vector<10x128xf32>
    %c0_4 = arith.constant 0 : index
    %c0_5 = arith.constant 0 : index
    %5 = vector.load %arg4[%c0_4, %c0_5] : memref<128x32xf32, #tpu.memory_space<vmem>>, vector<128x32xf32>
    %cst = arith.constant dense<0.000000e+00> : vector<10x32xf32>
    %6 = tpu.matmul %4, %5, %cst {dimension_numbers = #tpu.dot_dimension_numbers<[1], [0], [0], [1], [0, 0, 1, 1], [], []>} : vector<10x128xf32>, vector<128x32xf32>, vector<10x32xf32> -> vector<10x32xf32>
    %7 = arith.addf %3, %6 : vector<10x32xf32>
    %c0_6 = arith.constant 0 : index
    %c0_7 = arith.constant 0 : index
    %8 = vector.load %arg8[%c0_6, %c0_7] : memref<10x32xf32, #tpu.memory_space<vmem>>, vector<10x32xf32>
    tpu.vector_store %arg8[%c0_6, %c0_7], %7 {strides = array<i32>} : memref<10x32xf32, #tpu.memory_space<vmem>>, vector<10x32xf32>,
    %c0_i32_8 = arith.constant 0 : i32
    %9 = arith.cmpi eq, %arg2, %c0_i32_8 : i32
    %10 = arith.extui %9 : i1 to i32
    %c0_i32_9 = arith.constant 0 : i32
    %11 = arith.cmpi ne, %10, %c0_i32_9 : i32
    scf.if %11 {
      %c0_10 = arith.constant 0 : index
      %c0_11 = arith.constant 0 : index
      %12 = vector.load %arg8[%c0_10, %c0_11] : memref<10x32xf32, #tpu.memory_space<vmem>>, vector<10x32xf32>
      %c0_12 = arith.constant 0 : index
      %c0_13 = arith.constant 0 : index
      %13 = vector.load %arg5[%c0_12, %c0_13] : memref<1x32xf32, #tpu.memory_space<vmem>>, vector<1x32xf32>
      %14 = vector.broadcast %13 : vector<1x32xf32> to vector<10x32xf32>
      %15 = arith.addf %12, %14 : vector<10x32xf32>
      %c0_14 = arith.constant 0 : index
      %c0_15 = arith.constant 0 : index
      %16 = vector.load %arg6[%c0_14, %c0_15] : memref<10x32xf32, #tpu.memory_space<vmem>>, vector<10x32xf32>
      %17 = arith.addf %15, %16 : vector<10x32xf32>
      %c0_16 = arith.constant 0 : index
      %c0_17 = arith.constant 0 : index
      %18 = vector.load %arg7[%c0_16, %c0_17] : memref<10x32xf32, #tpu.memory_space<vmem>>, vector<10x32xf32>
      tpu.vector_store %arg7[%c0_16, %c0_17], %17 {strides = array<i32>} : memref<10x32xf32, #tpu.memory_space<vmem>>, vector<10x32xf32>,
    } else {
    }
    return
  }
  func.func @transform_0(%arg0: i32, %arg1: i32, %arg2: i32) -> (i32, i32) {
    %c0_i32 = arith.constant 0 : i32
    return %arg0, %arg2 : i32, i32
  }
  func.func @transform_1(%arg0: i32, %arg1: i32, %arg2: i32) -> (i32, i32) {
    %c0_i32 = arith.constant 0 : i32
    return %arg2, %arg1 : i32, i32
  }
  func.func @transform_2(%arg0: i32, %arg1: i32, %arg2: i32) -> (i32, i32) {
    %c0_i32 = arith.constant 0 : i32
    %c0_i32_0 = arith.constant 0 : i32
    return %c0_i32, %arg1 : i32, i32
  }
  func.func @transform_3(%arg0: i32, %arg1: i32, %arg2: i32) -> (i32, i32) {
    %c0_i32 = arith.constant 0 : i32
    return %arg0, %arg1 : i32, i32
  }
  func.func @transform_4(%arg0: i32, %arg1: i32, %arg2: i32) -> (i32, i32) {
    %c0_i32 = arith.constant 0 : i32
    return %arg0, %arg1 : i32, i32
  }
}

module attributes {stable_mosaic.version = 11 : i64} {
  func.func @_ln_matmul_kernel(%arg0: i32, %arg1: i32, %arg2: memref<2x32xf32, #tpu.memory_space<vmem>>, %arg3: memref<1x32xf32, #tpu.memory_space<vmem>>, %arg4: memref<1x32xf32, #tpu.memory_space<vmem>>, %arg5: memref<32x16xf32, #tpu.memory_space<vmem>>, %arg6: memref<1x16xf32, #tpu.memory_space<vmem>>, %arg7: memref<2x16xf32, #tpu.memory_space<vmem>>) attributes {dimension_semantics = [#tpu.dimension_semantics<parallel>, #tpu.dimension_semantics<parallel>], iteration_bounds = array<i64: 1, 1>, scalar_prefetch = 0 : i64, scratch_operands = 0 : i64, tpu.core_type = #tpu.core_type<tc>, window_params = [{transform_indices = @transform_0, window_bounds = array<i64: 2, 32>}, {pipeline_mode = #tpu.pipeline_mode<synchronous>, transform_indices = @transform_1, window_bounds = array<i64: 1, 32>}, {pipeline_mode = #tpu.pipeline_mode<synchronous>, transform_indices = @transform_2, window_bounds = array<i64: 1, 32>}, {transform_indices = @transform_3, window_bounds = array<i64: 32, 16>}, {transform_indices = @transform_4, window_bounds = array<i64: 1, 16>}, {transform_indices = @transform_5, window_bounds = array<i64: 2, 16>}]} {
    %c0 = arith.constant 0 : index
    %c0_0 = arith.constant 0 : index
    %0 = vector.load %arg2[%c0, %c0_0] : memref<2x32xf32, #tpu.memory_space<vmem>>, vector<2x32xf32>
    %cst = arith.constant dense<0.000000e+00> : vector<2xf32>
    %1 = vector.multi_reduction <add>, %0, %cst [1] : vector<2x32xf32> to vector<2xf32>
    %2 = vector.shape_cast %1 : vector<2xf32> to vector<2x1xf32>
    %cst_1 = arith.constant 3.200000e+01 : f32
    %3 = vector.broadcast %cst_1 : f32 to vector<2x1xf32>
    %4 = arith.divf %2, %3 : vector<2x1xf32>
    %5 = vector.broadcast %4 : vector<2x1xf32> to vector<2x32xf32>
    %6 = arith.subf %0, %5 : vector<2x32xf32>
    %7 = arith.mulf %6, %6 : vector<2x32xf32>
    %cst_2 = arith.constant dense<0.000000e+00> : vector<2xf32>
    %8 = vector.multi_reduction <add>, %7, %cst_2 [1] : vector<2x32xf32> to vector<2xf32>
    %9 = vector.shape_cast %8 : vector<2xf32> to vector<2x1xf32>
    %cst_3 = arith.constant 3.200000e+01 : f32
    %10 = vector.broadcast %cst_3 : f32 to vector<2x1xf32>
    %11 = arith.divf %9, %10 : vector<2x1xf32>
    %12 = vector.broadcast %4 : vector<2x1xf32> to vector<2x32xf32>
    %13 = arith.subf %0, %12 : vector<2x32xf32>
    %cst_4 = arith.constant 9.99999974E-6 : f32
    %14 = vector.broadcast %cst_4 : f32 to vector<2x1xf32>
    %15 = arith.addf %11, %14 : vector<2x1xf32>
    %16 = math.rsqrt %15 : vector<2x1xf32>
    %17 = vector.broadcast %16 : vector<2x1xf32> to vector<2x32xf32>
    %18 = arith.mulf %13, %17 : vector<2x32xf32>
    %c0_5 = arith.constant 0 : index
    %c0_6 = arith.constant 0 : index
    %19 = vector.load %arg3[%c0_5, %c0_6] : memref<1x32xf32, #tpu.memory_space<vmem>>, vector<1x32xf32>
    %20 = vector.broadcast %19 : vector<1x32xf32> to vector<2x32xf32>
    %21 = arith.mulf %18, %20 : vector<2x32xf32>
    %c0_7 = arith.constant 0 : index
    %c0_8 = arith.constant 0 : index
    %22 = vector.load %arg4[%c0_7, %c0_8] : memref<1x32xf32, #tpu.memory_space<vmem>>, vector<1x32xf32>
    %23 = vector.broadcast %22 : vector<1x32xf32> to vector<2x32xf32>
    %24 = arith.addf %21, %23 : vector<2x32xf32>
    %c0_9 = arith.constant 0 : index
    %c0_10 = arith.constant 0 : index
    %25 = vector.load %arg5[%c0_9, %c0_10] : memref<32x16xf32, #tpu.memory_space<vmem>>, vector<32x16xf32>
    %cst_11 = arith.constant dense<0.000000e+00> : vector<2x16xf32>
    %26 = tpu.matmul %24, %25, %cst_11 {dimension_numbers = #tpu.dot_dimension_numbers<[1], [0], [0], [1], [0, 0, 1, 1], [], []>} : vector<2x32xf32>, vector<32x16xf32>, vector<2x16xf32> -> vector<2x16xf32>
    %c0_12 = arith.constant 0 : index
    %c0_13 = arith.constant 0 : index
    %27 = vector.load %arg6[%c0_12, %c0_13] : memref<1x16xf32, #tpu.memory_space<vmem>>, vector<1x16xf32>
    %28 = vector.broadcast %27 : vector<1x16xf32> to vector<2x16xf32>
    %29 = arith.addf %26, %28 : vector<2x16xf32>
    %c0_14 = arith.constant 0 : index
    %c0_15 = arith.constant 0 : index
    %30 = vector.load %arg7[%c0_14, %c0_15] : memref<2x16xf32, #tpu.memory_space<vmem>>, vector<2x16xf32>
    tpu.vector_store %arg7[%c0_14, %c0_15], %29 {strides = array<i32>} : memref<2x16xf32, #tpu.memory_space<vmem>>, vector<2x16xf32>,
    return
  }
  func.func @transform_0(%arg0: i32, %arg1: i32) -> (i32, i32) {
    %c0_i32 = arith.constant 0 : i32
    %c0_i32_0 = arith.constant 0 : i32
    return %arg0, %c0_i32 : i32, i32
  }
  func.func @transform_1(%arg0: i32, %arg1: i32) -> (i32, i32) {
    %c0_i32 = arith.constant 0 : i32
    %c0_i32_0 = arith.constant 0 : i32
    %c0_i32_1 = arith.constant 0 : i32
    return %c0_i32, %c0_i32_0 : i32, i32
  }
  func.func @transform_2(%arg0: i32, %arg1: i32) -> (i32, i32) {
    %c0_i32 = arith.constant 0 : i32
    %c0_i32_0 = arith.constant 0 : i32
    %c0_i32_1 = arith.constant 0 : i32
    return %c0_i32, %c0_i32_0 : i32, i32
  }
  func.func @transform_3(%arg0: i32, %arg1: i32) -> (i32, i32) {
    %c0_i32 = arith.constant 0 : i32
    %c0_i32_0 = arith.constant 0 : i32
    return %c0_i32, %arg1 : i32, i32
  }
  func.func @transform_4(%arg0: i32, %arg1: i32) -> (i32, i32) {
    %c0_i32 = arith.constant 0 : i32
    %c0_i32_0 = arith.constant 0 : i32
    return %c0_i32, %arg1 : i32, i32
  }
  func.func @transform_5(%arg0: i32, %arg1: i32) -> (i32, i32) {
    %c0_i32 = arith.constant 0 : i32
    return %arg0, %arg1 : i32, i32
  }
}

</mosaic_0001>

<bundles_post_ra>
// kernel: vision_transformer_forward.14
= control target key start
LH: loop header
LB: loop body
LE: loop exit
PB: predicated region body
PF: predicated region fallthrough
CT: control target
= control target key end

     0   :  { %vm16_vm0 = vcmask 261120   ;;  %vm20_vm1 = vcmask 254976   ;;  %s119_s0 = inlined_call_operand.vmem [shape: f32[10,32], index: 0, kind: input, shape index: {}]   ;;  %s120_s1 = inlined_call_operand.vmem [shape: f32[1,32], index: 1, kind: input, shape index: {}]   ;;  %s121_s2 = inlined_call_operand.vmem [shape: f32[1,32], index: 2, kind: input, shape index: {}]   ;;  %s122_s3 = inlined_call_operand.vmem [shape: f32[10,32], index: 3, kind: output, shape index: {}]  }
   0x1   :  { %v14_v0 = vld [vmem:[%s119_s0] sm:$0xff]  ;;  %v15_v1 = vld [vmem:[%s119_s0 + $0x8] sm:$0x3] }
   0x2   :  { %v17_v2 = vsel %vm16_vm0, %v14_v0, 0.0  ;;  %v21_v3 = vsel %vm20_vm1, %v15_v1, 0.0  ;;  %v69_v21 = vld [vmem:[%s120_s1] ss:$0 sm:$0xff] }
   0x3   :  { %18 = vadd.xlane.f32.xlu0 %v17_v2  ;;  %v70_v23 = vld [vmem:[%s121_s2] ss:$0 sm:$0xff] }
   0x7   :  { %22 = vadd.xlane.f32.xlu0 %v21_v3 }
  0x8c   :  { %v19_v4 = vpop.xlane.xlu0 %18 }
  0x8d   :  { %v25_v5 = vmul.f32 0.03125, %v19_v4 }
  0x8f   :  { %v27_v6 = vsub.f32 %v14_v0, %v25_v5 }
  0x90   :  { %v23_v7 = vpop.xlane.xlu0 %22 }
  0x91   :  { %v26_v8 = vmul.f32 0.03125, %v23_v7  ;;  %v29_v9 = vmul.f32 %v27_v6, %v27_v6 }
  0x93   :  { %v28_v10 = vsub.f32 %v15_v1, %v26_v8  ;;  %v31_v11 = vsel %vm16_vm0, %v29_v9, 0.0 }
  0x94   :  { %32 = vadd.xlane.f32.xlu1 %v31_v11 }
  0x95   :  { %v30_v12 = vmul.f32 %v28_v10, %v28_v10 }
  0x97   :  { %v34_v13 = vsel %vm20_vm1, %v30_v12, 0.0 }
  0x98   :  { %35 = vadd.xlane.f32.xlu1 %v34_v13 }
 0x11d   :  { %v33_v14 = vpop.xlane.xlu1 %32 }
 0x11e   :  { %v37_v15 = vmul.f32 0.03125, %v33_v14 }
 0x120   :  { %v39_v16 = vadd.f32 1e-05, %v37_v15 }
 0x121   :  { %v36_v17 = vpop.xlane.xlu1 %35 }
 0x122   :  { %71 = vrsqrt.f32 %v39_v16  ;;  %v38_v18 = vmul.f32 0.03125, %v36_v17 }
 0x124   :  { %v40_v19 = vadd.f32 1e-05, %v38_v18 }
 0x126   :  { %73 = vrsqrt.f32 %v40_v19 }
 0x12f   :  { %v72_v20 = vpop.eup %71 }
 0x130   :  { %v43_v22 = vmul.f32 %v72_v20, %v27_v6 }
 0x132   :  { %v52_v24 = vmul.f32 %v69_v21, %v43_v22 }
 0x133   :  { %v74_v25 = vpop.eup %73 }
 0x134   :  { %v61_v26 = vadd.f32 %v70_v23, %v52_v24  ;;  %v44_v27 = vmul.f32 %v74_v25, %v28_v10 }
 0x136   :  { %63 = vst.msk [vmem:[%s122_s3] sm:$0xff] %vm16_vm0, %v61_v26  ;;  %v53_v28 = vmul.f32 %v69_v21, %v44_v27 }
 0x138   :  { %v62_v29 = vadd.f32 %v70_v23, %v53_v28 }
 0x13a   :  { %64 = vst.msk [vmem:[%s122_s3 + $0x8] sm:$0x3] %vm20_vm1, %v62_v29 }

// kernel: vision_transformer_forward.13
= control target key start
LH: loop header
LB: loop body
LE: loop exit
PB: predicated region body
PF: predicated region fallthrough
CT: control target
= control target key end

     0   :  { %vm18_vm0 = vcmask 261120   ;;  %v144_v0 = vmov 0.0   ;;  %vm47_vm1 = vcmask 523264   ;;  %s277_s1 = inlined_call_operand.vmem [shape: f32[192,32], index: 1, kind: input, shape index: {}]   ;;  %s278_s0 = inlined_call_operand.vmem [shape: f32[8,192], index: 0, kind: input, shape index: {}]   ;;  %s279_s2 = inlined_call_operand.vmem [shape: f32[1,32], index: 2, kind: input, shape index: {}]   ;;  %s280_s3 = inlined_call_operand.vmem [shape: f32[8,32], index: 3, kind: output, shape index: {}]  }
   0x1   :  { %51 = vmatprep.subr.mxu0 %v144_v0  ;;  %v38_v1 = vld [vmem:[%s277_s1 + $0x78] sm:$0xff]  ;;  %v37_v2 = vld [vmem:[%s277_s1 + $0x70] sm:$0xff]  ;;  %19 = vst.msk [vmem:[#allocation2] sm:$0xff] %vm18_vm0, %v144_v0  ;;  %v36_v3 = vld [vmem:[%s277_s1 + $0x68] sm:$0xff] }
   0x2   :  { %52 = vmatpush1.msra.mxu0 %v38_v1  ;;  %v35_v4 = vld [vmem:[%s277_s1 + $0x60] sm:$0xff]  ;;  %v34_v5 = vld [vmem:[%s277_s1 + $0x58] sm:$0xff]  ;;  %v33_v6 = vld [vmem:[%s277_s1 + $0x50] sm:$0xff] }
   0x3   :  { %53 = vmatprep.subr.mxu0 %v144_v0  ;;  %v22_v7 = vld [vmem:[%s278_s0 + $0x8] sm:$0xff]  ;;  %v31_v9 = vld [vmem:[%s277_s1 + $0x40] sm:$0xff]  ;;  %v30_v10 = vld [vmem:[%s277_s1 + $0x38] sm:$0xff] }
   0x4   :  { %54 = vmatpush1.msra.mxu0 %v37_v2  ;;  %141 = vmatprep.mubr.msk.f32.mxu0 %vm47_vm1, %v22_v7  ;;  %v32_v8 = vld [vmem:[%s277_s1 + $0x48] sm:$0xff]  ;;  %v29_v11 = vld [vmem:[%s277_s1 + $0x30] sm:$0xff]  ;;  %v27_v13 = vld [vmem:[%s277_s1 + $0x20] sm:$0xff] }
   0x5   :  { %55 = vmatprep.subr.mxu0 %v144_v0  ;;  %v28_v12 = vld [vmem:[%s277_s1 + $0x28] sm:$0xff]  ;;  %v26_v14 = vld [vmem:[%s277_s1 + $0x18] sm:$0xff]  ;;  %v25_v15 = vld [vmem:[%s277_s1 + $0x10] sm:$0xff] }
   0x6   :  { %56 = vmatpush1.msra.mxu0 %v36_v3  ;;  %v24_v16 = vld [vmem:[%s277_s1 + $0x8] sm:$0xff]  ;;  %v23_v17 = vld [vmem:[%s277_s1] sm:$0xff]  ;;  %v46_v18 = vld [vmem:[%s277_s1 + $0xb8] sm:$0xff] }
   0x7   :  { %57 = vmatprep.subr.mxu0 %v144_v0  ;;  %v45_v19 = vld [vmem:[%s277_s1 + $0xb0] sm:$0xff]  ;;  %v44_v20 = vld [vmem:[%s277_s1 + $0xa8] sm:$0xff]  ;;  %v43_v21 = vld [vmem:[%s277_s1 + $0xa0] sm:$0xff] }
   0x8   :  { %58 = vmatpush1.msra.mxu0 %v35_v4  ;;  %v42_v22 = vld [vmem:[%s277_s1 + $0x98] sm:$0xff]  ;;  %v41_v23 = vld [vmem:[%s277_s1 + $0x90] sm:$0xff]  ;;  %v40_v24 = vld [vmem:[%s277_s1 + $0x88] sm:$0xff] }
   0x9   :  { %59 = vmatprep.subr.mxu0 %v144_v0  ;;  %v39_v25 = vld [vmem:[%s277_s1 + $0x80] sm:$0xff] }
   0xa   :  { %60 = vmatpush1.msra.mxu0 %v34_v5  ;;  %v21_v26 = vld [vmem:[%s278_s0] sm:$0xff] }
   0xb   :  { %61 = vmatprep.subr.mxu0 %v144_v0  ;;  %v20_v27 = vld [vmem:[#allocation2] sm:$0xff] }
   0xc   :  { %62 = vmatpush1.msra.mxu0 %v33_v6  ;;  %v142_v31 = vld [vmem:[%s279_s2] ss:$0 sm:$0xff] }
   0xd   :  { %63 = vmatprep.subr.mxu0 %v144_v0 }
   0xe   :  { %64 = vmatpush1.msra.mxu0 %v32_v8 }
   0xf   :  { %65 = vmatprep.subr.mxu0 %v144_v0 }
  0x10   :  { %66 = vmatpush1.msra.mxu0 %v31_v9 }
  0x11   :  { %67 = vmatprep.subr.mxu0 %v144_v0 }
  0x12   :  { %68 = vmatpush1.msra.mxu0 %v30_v10 }
  0x13   :  { %69 = vmatprep.subr.mxu0 %v144_v0 }
  0x14   :  { %70 = vmatpush1.msra.mxu0 %v29_v11 }
  0x15   :  { %71 = vmatprep.subr.mxu0 %v144_v0 }
  0x16   :  { %72 = vmatpush1.msra.mxu0 %v28_v12 }
  0x17   :  { %73 = vmatprep.subr.mxu0 %v144_v0 }
  0x18   :  { %74 = vmatpush1.msra.mxu0 %v27_v13 }
  0x19   :  { %75 = vmatprep.subr.mxu0 %v144_v0 }
  0x1a   :  { %76 = vmatpush1.msra.mxu0 %v26_v14 }
  0x1b   :  { %77 = vmatprep.subr.mxu0 %v144_v0 }
  0x1c   :  { %78 = vmatpush1.msra.mxu0 %v25_v15 }
  0x1d   :  { %79 = vmatprep.subr.mxu0 %v144_v0 }
  0x1e   :  { %80 = vmatpush1.msra.mxu0 %v24_v16 }
  0x1f   :  { %81 = vmatprep.subr.mxu0 %v144_v0 }
  0x20   :  { %82 = vmatpush1.msra.mxu0 %v23_v17 }
  0x21   :  { %99 = vmatprep.subr.mxu0 %v144_v0 }
  0x22   :  { %100 = vmatpush2.msra.mxu0 %v46_v18 }
  0x23   :  { %101 = vmatprep.subr.mxu0 %v144_v0 }
  0x24   :  { %102 = vmatpush2.msra.mxu0 %v45_v19 }
  0x25   :  { %103 = vmatprep.subr.mxu0 %v144_v0 }
  0x26   :  { %104 = vmatpush2.msra.mxu0 %v44_v20 }
  0x27   :  { %105 = vmatprep.subr.mxu0 %v144_v0 }
  0x28   :  { %106 = vmatpush2.msra.mxu0 %v43_v21 }
  0x29   :  { %107 = vmatprep.subr.mxu0 %v144_v0 }
  0x2a   :  { %108 = vmatpush2.msra.mxu0 %v42_v22 }
  0x2b   :  { %109 = vmatprep.subr.mxu0 %v144_v0 }
  0x2c   :  { %110 = vmatpush2.msra.mxu0 %v41_v23 }
  0x2d   :  { %111 = vmatprep.subr.mxu0 %v144_v0 }
  0x2e   :  { %112 = vmatpush2.msra.mxu0 %v40_v24 }
  0x2f   :  { %113 = vmatprep.subr.mxu0 %v144_v0 }
  0x30   :  { %114 = vmatpush2.msra.mxu0 %v39_v25 }
  0x31   :  { %116 = vmatmul.mubr.f32.vlgmr.msra.gmra.mxu0 %v21_v26 }
  0xf1   :  { %v117_v28 = vpop.f32.mrf.mxu0 }
  0xf2   :  { %v121_v29 = vadd.f32 %v117_v28, %v20_v27 }
  0xf3   :  { %v119_v30 = vpop.f32.mrf.mxu0 }
  0xf4   :  { %123 = vst.msk [vmem:[#allocation2] sm:$0xff] %vm18_vm0, %v121_v29 }
  0xfb   :  { %v127_v32 = vld [vmem:[#allocation2] sm:$0xff] }
  0xfc   :  { %v135_v33 = vadd.f32 %v142_v31, %v127_v32 }
  0xfe   :  { %136 = vst.msk [vmem:[%s280_s3] sm:$0xff] %vm18_vm0, %v135_v33 }

// kernel: vision_transformer_forward.15
= control target key start
LH: loop header
LB: loop body
LE: loop exit
PB: predicated region body
PF: predicated region fallthrough
CT: control target
= control target key end

     0   :  { %vm22_vm0 = vcmask 261120   ;;  %vm26_vm1 = vcmask 254976   ;;  %vm163_vm2 = vcmask 779264   ;;  %vm161_vm3 = vcmask 785408   ;;  %s262_s0 = inlined_call_operand.vmem [shape: f32[10,32], index: 0, kind: input, shape index: {}]   ;;  %s263_s3 = inlined_call_operand.vmem [shape: f32[32,96], index: 3, kind: input, shape index: {}]   ;;  %s264_s1 = inlined_call_operand.vmem [shape: f32[1,32], index: 1, kind: input, shape index: {}]   ;;  %s265_s2 = inlined_call_operand.vmem [shape: f32[1,32], index: 2, kind: input, shape index: {}]   ;;  %s266_s4 = inlined_call_operand.vmem [shape: f32[1,96], index: 4, kind: input, shape index: {}]   ;;  %s267_s5 = inlined_call_operand.vmem [shape: f32[10,96], index: 5, kind: output, shape index: {}]  }
   0x1   :  { %v20_v0 = vld [vmem:[%s262_s0] sm:$0xff]  ;;  %v21_v1 = vld [vmem:[%s262_s0 + $0x8] sm:$0x3]  ;;  %v72_v14 = vld [vmem:[%s263_s3 + $0x18] sm:$0xff] }
   0x2   :  { %v23_v2 = vsel %vm22_vm0, %v20_v0, 0.0  ;;  %v27_v3 = vsel %vm26_vm1, %v21_v1, 0.0  ;;  %v71_v15 = vld [vmem:[%s263_s3 + $0x10] sm:$0xff]  ;;  %180 = vmatprep.subr.mxu0 %v72_v14  ;;  %v70_v16 = vld [vmem:[%s263_s3 + $0x8] sm:$0xff]  ;;  %v69_v17 = vld [vmem:[%s263_s3] sm:$0xff] }
   0x3   :  { %24 = vadd.xlane.f32.xlu0 %v23_v2  ;;  %181 = vmatpush3.msra.mxu0 %v72_v14  ;;  %v169_v25 = vld [vmem:[%s264_s1] ss:$0 sm:$0xff] }
   0x4   :  { %182 = vmatprep.subr.mxu0 %v71_v15  ;;  %v170_v27 = vld [vmem:[%s265_s2] ss:$0 sm:$0xff] }
   0x5   :  { %183 = vmatpush3.msra.mxu0 %v71_v15  ;;  %v171_v34 = vld [vmem:[%s266_s4] ss:$0 sm:$0xff] }
   0x6   :  { %184 = vmatprep.subr.mxu0 %v70_v16 }
   0x7   :  { %28 = vadd.xlane.f32.xlu0 %v27_v3  ;;  %185 = vmatpush3.msra.mxu0 %v70_v16 }
   0x8   :  { %186 = vmatprep.subr.mxu0 %v69_v17 }
   0x9   :  { %187 = vmatpush3.msra.mxu0 %v69_v17 }
  0x8c   :  { %v25_v4 = vpop.xlane.xlu0 %24 }
  0x8d   :  { %v31_v5 = vmul.f32 0.03125, %v25_v4 }
  0x8f   :  { %v33_v6 = vsub.f32 %v20_v0, %v31_v5 }
  0x90   :  { %v29_v7 = vpop.xlane.xlu0 %28 }
  0x91   :  { %v32_v8 = vmul.f32 0.03125, %v29_v7  ;;  %v35_v9 = vmul.f32 %v33_v6, %v33_v6 }
  0x93   :  { %v34_v10 = vsub.f32 %v21_v1, %v32_v8  ;;  %v37_v11 = vsel %vm22_vm0, %v35_v9, 0.0 }
  0x94   :  { %38 = vadd.xlane.f32.xlu1 %v37_v11 }
  0x95   :  { %v36_v12 = vmul.f32 %v34_v10, %v34_v10 }
  0x97   :  { %v40_v13 = vsel %vm26_vm1, %v36_v12, 0.0 }
  0x98   :  { %41 = vadd.xlane.f32.xlu1 %v40_v13 }
 0x11d   :  { %v39_v18 = vpop.xlane.xlu1 %38 }
 0x11e   :  { %v43_v19 = vmul.f32 0.03125, %v39_v18 }
 0x120   :  { %v45_v20 = vadd.f32 1e-05, %v43_v19 }
 0x121   :  { %v42_v21 = vpop.xlane.xlu1 %41 }
 0x122   :  { %191 = vrsqrt.f32 %v45_v20  ;;  %v44_v22 = vmul.f32 0.03125, %v42_v21 }
 0x124   :  { %v46_v23 = vadd.f32 1e-05, %v44_v22 }
 0x126   :  { %193 = vrsqrt.f32 %v46_v23 }
 0x12f   :  { %v192_v24 = vpop.eup %191 }
 0x130   :  { %v49_v26 = vmul.f32 %v192_v24, %v33_v6 }
 0x132   :  { %v58_v28 = vmul.f32 %v169_v25, %v49_v26 }
 0x133   :  { %v194_v29 = vpop.eup %193 }
 0x134   :  { %v50_v30 = vmul.f32 %v194_v29, %v34_v10  ;;  %v67_v31 = vadd.f32 %v170_v27, %v58_v28 }
 0x136   :  { %v59_v32 = vmul.f32 %v169_v25, %v50_v30  ;;  %188 = vmatprep.mubr.msk.f32.mxu0 %vm22_vm0, %v67_v31 }
 0x138   :  { %v68_v33 = vadd.f32 %v170_v27, %v59_v32 }
 0x13a   :  { %189 = vmatmul.mubr.msk.f32.vlgmr.msra.gmra.mxu0 %vm22_vm0, %v68_v33 }
 0x1fa   :  { %v190_v35 = vpop.f32.mrf.mxu0 }
 0x1fb   :  { %v158_v36 = vadd.f32 %v190_v35, %v171_v34 }
 0x1fc   :  { %v152_v37 = vpop.f32.mrf.mxu0 }
 0x1fd   :  { %164 = vst.msk [vmem:[%s267_s5 + $0x8] sm:$0x3] %vm163_vm2, %v158_v36  ;;  %v153_v38 = vadd.f32 %v171_v34, %v152_v37 }
 0x1ff   :  { %162 = vst.msk [vmem:[%s267_s5] sm:$0xff] %vm161_vm3, %v153_v38 }

// kernel: vision_transformer_forward.16
= control target key start
LH: loop header
LB: loop body
LE: loop exit
PB: predicated region body
PF: predicated region fallthrough
CT: control target
= control target key end

     0   :  { %vm38_vm0 = vcmask 64512   ;;  %v1545_v0 = vmov 0.0   ;;  %vm1546_vm1 = vmmov 0   ;;  %vm647_vm2 = vcmask 36864   ;;  %s1779_s1 = inlined_call_operand.vmem [shape: f32[8,5,8], index: 1, kind: input, shape index: {}]   ;;  %s1780_s0 = inlined_call_operand.vmem [shape: f32[8,5,8], index: 0, kind: input, shape index: {}]   ;;  %s1781_s2 = inlined_call_operand.vmem [shape: f32[8,5,8], index: 2, kind: input, shape index: {}]   ;;  %s1782_s3 = inlined_call_operand.vmem [shape: f32[8,5,8], index: 3, kind: output, shape index: {}]  }
   0x1   :  { %1431 = vmatprep.subr.mxu0 %v1545_v0  ;;  %v30_v1 = vld [vmem:[%s1779_s1] sm:$0x1f]  ;;  %1433 = vmatprep.mubr.msk.f32.mxu0 %vm1546_vm1, %v1545_v0  ;;  %v31_v3 = vld [vmem:[%s1779_s1 + $0x8] sm:$0x1f]  ;;  %v32_v6 = vld [vmem:[%s1779_s1 + $0x10] sm:$0x1f] }
   0x2   :  { %v14_v2 = vld [vmem:[%s1780_s0] sm:$0x1f]  ;;  %1432 = vmatpush3.xpose.msk.msra.mxu0 %vm38_vm0, %v30_v1  ;;  %1436 = vmatprep.subr.mxu1 %v1545_v0  ;;  %v15_v5 = vld [vmem:[%s1780_s0 + $0x8] sm:$0x1f]  ;;  %v16_v8 = vld [vmem:[%s1780_s0 + $0x10] sm:$0x1f] }
   0x3   :  { %v22_v4 = vmul.f32 0.35355338, %v14_v2  ;;  %1437 = vmatpush3.xpose.msk.msra.mxu1 %vm38_vm0, %v31_v3  ;;  %1441 = vmatprep.subr.mxu0 %v1545_v0  ;;  %v23_v7 = vmul.f32 0.35355338, %v15_v5  ;;  %v33_v9 = vld [vmem:[%s1779_s1 + $0x18] sm:$0x1f] }
   0x4   :  { %1438 = vmatprep.mubr.msk.f32.mxu1 %vm1546_vm1, %v1545_v0  ;;  %1446 = vmatprep.subr.mxu1 %v1545_v0  ;;  %v17_v10 = vld [vmem:[%s1780_s0 + $0x18] sm:$0x1f]  ;;  %v24_v11 = vmul.f32 0.35355338, %v16_v8  ;;  %v18_v13 = vld [vmem:[%s1780_s0 + $0x20] sm:$0x1f] }
   0x5   :  { %1434 = vmatmul.mubr.msk.f32.vlgmr.msra.gmra.mxu0 %vm38_vm0, %v22_v4  ;;  %v25_v12 = vmul.f32 0.35355338, %v17_v10  ;;  %v34_v14 = vld [vmem:[%s1779_s1 + $0x20] sm:$0x1f]  ;;  %v19_v15 = vld [vmem:[%s1780_s0 + $0x28] sm:$0x1f] }
   0x6   :  { %1442 = vmatpush3.xpose.msk.msra.mxu0 %vm38_vm0, %v32_v6  ;;  %1439 = vmatmul.mubr.msk.f32.vlgmr.msra.gmra.mxu1 %vm38_vm0, %v23_v7  ;;  %v35_v16 = vld [vmem:[%s1779_s1 + $0x28] sm:$0x1f]  ;;  %v26_v17 = vmul.f32 0.35355338, %v18_v13  ;;  %v27_v18 = vmul.f32 0.35355338, %v19_v15 }
   0x7   :  { %1443 = vmatprep.mubr.msk.f32.mxu0 %vm1546_vm1, %v1545_v0  ;;  %1447 = vmatpush3.xpose.msk.msra.mxu1 %vm38_vm0, %v33_v9  ;;  %v20_v19 = vld [vmem:[%s1780_s0 + $0x30] sm:$0x1f]  ;;  %v21_v21 = vld [vmem:[%s1780_s0 + $0x38] sm:$0x1f]  ;;  %vm748_vm3 = vcmask 1044480   ;;  %vm744_vm4 = vcmask 39936  }
   0x8   :  { %1451 = vmatprep.subr.mxu0 %v1545_v0  ;;  %1448 = vmatprep.mubr.msk.f32.mxu1 %vm1546_vm1, %v1545_v0  ;;  %v36_v20 = vld [vmem:[%s1779_s1 + $0x30] sm:$0x1f]  ;;  %v37_v22 = vld [vmem:[%s1779_s1 + $0x38] sm:$0x1f]  ;;  %v28_v23 = vmul.f32 0.35355338, %v20_v19 }
   0x9   :  { %1444 = vmatmul.mubr.msk.f32.vlgmr.msra.gmra.mxu0 %vm38_vm0, %v24_v11  ;;  %1456 = vmatprep.subr.mxu1 %v1545_v0  ;;  %v29_v24 = vmul.f32 0.35355338, %v21_v21  ;;  %vm1354_vm5 = vcmask 61440  }
   0xa   :  { %1452 = vmatpush3.xpose.msk.msra.mxu0 %vm38_vm0, %v34_v14  ;;  %1449 = vmatmul.mubr.msk.f32.vlgmr.msra.gmra.mxu1 %vm38_vm0, %v25_v12 }
   0xb   :  { %1453 = vmatprep.mubr.msk.f32.mxu0 %vm1546_vm1, %v1545_v0  ;;  %1457 = vmatpush3.xpose.msk.msra.mxu1 %vm38_vm0, %v35_v16 }
   0xc   :  { %1461 = vmatprep.subr.mxu0 %v1545_v0  ;;  %1458 = vmatprep.mubr.msk.f32.mxu1 %vm1546_vm1, %v1545_v0 }
   0xd   :  { %1454 = vmatmul.mubr.msk.f32.vlgmr.msra.gmra.mxu0 %vm38_vm0, %v26_v17  ;;  %1466 = vmatprep.subr.mxu1 %v1545_v0 }
   0xe   :  { %1462 = vmatpush3.xpose.msk.msra.mxu0 %vm38_vm0, %v36_v20  ;;  %1459 = vmatmul.mubr.msk.f32.vlgmr.msra.gmra.mxu1 %vm38_vm0, %v27_v18 }
   0xf   :  { %1463 = vmatprep.mubr.msk.f32.mxu0 %vm1546_vm1, %v1545_v0  ;;  %1467 = vmatpush3.xpose.msk.msra.mxu1 %vm38_vm0, %v37_v22 }
  0x10   :  { %1468 = vmatprep.mubr.msk.f32.mxu1 %vm1546_vm1, %v1545_v0  ;;  %1471 = vmatprep.subr.mxu0 %v1545_v0 }
  0x11   :  { %1464 = vmatmul.mubr.msk.f32.vlgmr.msra.gmra.mxu0 %vm38_vm0, %v28_v23  ;;  %1476 = vmatprep.subr.mxu1 %v1545_v0 }
  0x12   :  { %1469 = vmatmul.mubr.msk.f32.vlgmr.msra.gmra.mxu1 %vm38_vm0, %v29_v24  ;;  %1473 = vmatprep.mubr.msk.f32.mxu0 %vm1546_vm1, %v1545_v0 }
  0x13   :  { %1478 = vmatprep.mubr.msk.f32.mxu1 %vm1546_vm1, %v1545_v0 }
  0xc5   :  { %v111_v25 = vpop.f32.mrf.mxu0 }
  0xc6   :  { %v648_v26 = vsel %vm647_vm2, %v111_v25, -inf  ;;  %v187_v27 = vpop.f32.mrf.mxu1 }
  0xc7   :  { %649 = vmax.xlane.f32.xlu0 %v648_v26  ;;  %v1435_v28 = vpop.f32.mrf.mxu0  ;;  %v651_v30 = vsel %vm647_vm2, %v187_v27, -inf  ;;  %v736_v26 = vld [vmem:[%s1781_s2] sm:$0x1f] }
  0xc8   :  { %v1440_v29 = vpop.f32.mrf.mxu1  ;;  %1472 = vmatpush3.msk.msra.mxu0 %vm748_vm3, %v736_v26 }
  0xc9   :  { %v263_v31 = vpop.f32.mrf.mxu0  ;;  %1481 = vmatprep.subr.mxu0 %v1545_v0 }
  0xca   :  { %v654_v32 = vsel %vm647_vm2, %v263_v31, -inf  ;;  %v339_v33 = vpop.f32.mrf.mxu1 }
  0xcb   :  { %652 = vmax.xlane.f32.xlu0 %v651_v30  ;;  %655 = vmax.xlane.f32.xlu1 %v654_v32  ;;  %v1445_v34 = vpop.f32.mrf.mxu0  ;;  %v657_v36 = vsel %vm647_vm2, %v339_v33, -inf }
  0xcc   :  { %v1450_v35 = vpop.f32.mrf.mxu1 }
  0xcd   :  { %v415_v37 = vpop.f32.mrf.mxu0 }
  0xce   :  { %v660_v38 = vsel %vm647_vm2, %v415_v37, -inf  ;;  %v491_v39 = vpop.f32.mrf.mxu1 }
  0xcf   :  { %658 = vmax.xlane.f32.xlu1 %v657_v36  ;;  %661 = vmax.xlane.f32.xlu0 %v660_v38  ;;  %v1455_v40 = vpop.f32.mrf.mxu0  ;;  %v663_v42 = vsel %vm647_vm2, %v491_v39, -inf }
  0xd0   :  { %v1460_v41 = vpop.f32.mrf.mxu1 }
  0xd1   :  { %v567_v43 = vpop.f32.mrf.mxu0 }
  0xd2   :  { %v666_v44 = vsel %vm647_vm2, %v567_v43, -inf  ;;  %v643_v45 = vpop.f32.mrf.mxu1 }
  0xd3   :  { %664 = vmax.xlane.f32.xlu1 %v663_v42  ;;  %667 = vmax.xlane.f32.xlu0 %v666_v44  ;;  %v1465_v46 = vpop.f32.mrf.mxu0  ;;  %v669_v48 = vsel %vm647_vm2, %v643_v45, -inf  ;;  %v739_v42 = vld [vmem:[%s1781_s2 + $0x18] sm:$0x1f]  ;;  %v740_v44 = vld [vmem:[%s1781_s2 + $0x20] sm:$0x1f] }
  0xd4   :  { %v1470_v47 = vpop.f32.mrf.mxu1 }
  0xd7   :  { %670 = vmax.xlane.f32.xlu1 %v669_v48  ;;  %v741_v48 = vld [vmem:[%s1781_s2 + $0x28] sm:$0x1f] }
 0x150   :  { %v650_v49 = vpop.xlane.xlu0 %649 }
 0x151   :  { %v672_v50 = vsub.f32 %v111_v25, %v650_v49 }
 0x153   :  { %v680_v51 = vmul.f32 1.442695, %v672_v50  ;;  %v742_v50 = vld [vmem:[%s1781_s2 + $0x30] sm:$0x1f] }
 0x154   :  { %v653_v52 = vpop.xlane.xlu0 %652  ;;  %v656_v53 = vpop.xlane.xlu1 %655 }
 0x155   :  { %1513 = vpow2.f32 %v680_v51  ;;  %v673_v54 = vsub.f32 %v187_v27, %v653_v52  ;;  %v674_v55 = vsub.f32 %v263_v31, %v656_v53  ;;  %v737_v27 = vld [vmem:[%s1781_s2 + $0x8] sm:$0x1f] }
 0x156   :  { %1477 = vmatpush3.msk.msra.mxu1 %vm748_vm3, %v737_v27 }
 0x157   :  { %v682_v56 = vmul.f32 1.442695, %v673_v54  ;;  %v684_v57 = vmul.f32 1.442695, %v674_v55  ;;  %1486 = vmatprep.subr.mxu1 %v1545_v0  ;;  %v743_v54 = vld [vmem:[%s1781_s2 + $0x38] sm:$0x1f] }
 0x158   :  { %v659_v58 = vpop.xlane.xlu1 %658  ;;  %v662_v59 = vpop.xlane.xlu0 %661 }
 0x159   :  { %1515 = vpow2.f32 %v682_v56  ;;  %v675_v60 = vsub.f32 %v339_v33, %v659_v58  ;;  %v676_v61 = vsub.f32 %v415_v37, %v662_v59  ;;  %v738_v37 = vld [vmem:[%s1781_s2 + $0x10] sm:$0x1f] }
 0x15a   :  { %1517 = vpow2.f32 %v684_v57 }
 0x15b   :  { %v686_v62 = vmul.f32 1.442695, %v675_v60  ;;  %v688_v63 = vmul.f32 1.442695, %v676_v61 }
 0x15c   :  { %v665_v1 = vpop.xlane.xlu1 %664  ;;  %v668_v2 = vpop.xlane.xlu0 %667 }
 0x15d   :  { %1519 = vpow2.f32 %v686_v62  ;;  %v677_v3 = vsub.f32 %v491_v39, %v665_v1  ;;  %v678_v4 = vsub.f32 %v567_v43, %v668_v2 }
 0x15e   :  { %1521 = vpow2.f32 %v688_v63 }
 0x15f   :  { %v690_v5 = vmul.f32 1.442695, %v677_v3  ;;  %v692_v6 = vmul.f32 1.442695, %v678_v4 }
 0x160   :  { %v671_v7 = vpop.xlane.xlu1 %670 }
 0x161   :  { %1523 = vpow2.f32 %v690_v5  ;;  %v679_v8 = vsub.f32 %v643_v45, %v671_v7 }
 0x162   :  { %v1514_v9 = vpop.eup %1513  ;;  %1525 = vpow2.f32 %v692_v6 }
 0x163   :  { %v694_v10 = vmul.f32 1.442695, %v679_v8  ;;  %v696_v11 = vsel %vm647_vm2, %v1514_v9, 0.0 }
 0x164   :  { %697 = vadd.xlane.f32.xlu0 %v696_v11 }
 0x165   :  { %1527 = vpow2.f32 %v694_v10 }
 0x166   :  { %v1516_v12 = vpop.eup %1515 }
 0x167   :  { %v1518_v13 = vpop.eup %1517  ;;  %v699_v14 = vsel %vm647_vm2, %v1516_v12, 0.0 }
 0x168   :  { %700 = vadd.xlane.f32.xlu1 %v699_v14  ;;  %v702_v15 = vsel %vm647_vm2, %v1518_v13, 0.0 }
 0x169   :  { %703 = vadd.xlane.f32.xlu0 %v702_v15 }
 0x16a   :  { %v1520_v16 = vpop.eup %1519 }
 0x16b   :  { %v1522_v17 = vpop.eup %1521  ;;  %v705_v18 = vsel %vm647_vm2, %v1520_v16, 0.0 }
 0x16c   :  { %706 = vadd.xlane.f32.xlu1 %v705_v18  ;;  %v708_v19 = vsel %vm647_vm2, %v1522_v17, 0.0 }
 0x16d   :  { %709 = vadd.xlane.f32.xlu0 %v708_v19 }
 0x16e   :  { %v1674_v20 = vpop.eup %1523 }
 0x16f   :  { %v1676_v21 = vpop.eup %1525  ;;  %v711_v22 = vsel %vm647_vm2, %v1674_v20, 0.0 }
 0x170   :  { %712 = vadd.xlane.f32.xlu1 %v711_v22  ;;  %v714_v23 = vsel %vm647_vm2, %v1676_v21, 0.0 }
 0x171   :  { %715 = vadd.xlane.f32.xlu0 %v714_v23 }
 0x172   :  { %v1682_v24 = vpop.eup %1527 }
 0x173   :  { %v717_v25 = vsel %vm647_vm2, %v1682_v24, 0.0 }
 0x174   :  { %718 = vadd.xlane.f32.xlu1 %v717_v25 }
 0x1ed   :  { %v698_v28 = vpop.xlane.xlu0 %697 }
 0x1ee   :  { %1529 = vrcp.f32 %v698_v28 }
 0x1f1   :  { %v701_v29 = vpop.xlane.xlu1 %700 }
 0x1f2   :  { %1531 = vrcp.f32 %v701_v29  ;;  %v704_v30 = vpop.xlane.xlu0 %703 }
 0x1f3   :  { %1533 = vrcp.f32 %v704_v30 }
 0x1f5   :  { %v707_v31 = vpop.xlane.xlu1 %706 }
 0x1f6   :  { %1535 = vrcp.f32 %v707_v31  ;;  %v710_v32 = vpop.xlane.xlu0 %709 }
 0x1f7   :  { %1537 = vrcp.f32 %v710_v32 }
 0x1f9   :  { %v713_v33 = vpop.xlane.xlu1 %712 }
 0x1fa   :  { %1539 = vrcp.f32 %v713_v33  ;;  %v716_v34 = vpop.xlane.xlu0 %715 }
 0x1fb   :  { %v1530_v35 = vpop.eup %1529  ;;  %1541 = vrcp.f32 %v716_v34 }
 0x1fc   :  { %v728_v36 = vmul.f32 %v1530_v35, %v1514_v9 }
 0x1fd   :  { %v719_v38 = vpop.xlane.xlu1 %718 }
 0x1fe   :  { %1543 = vrcp.f32 %v719_v38  ;;  %1474 = vmatmul.mubr.msk.f32.vlgmr.msra.gmra.mxu0 %vm744_vm4, %v728_v36 }
 0x1ff   :  { %v1532_v39 = vpop.eup %1531  ;;  %1482 = vmatpush3.msk.msra.mxu0 %vm748_vm3, %v738_v37  ;;  %1483 = vmatprep.mubr.msk.f32.mxu0 %vm1546_vm1, %v1545_v0 }
 0x200   :  { %v1534_v40 = vpop.eup %1533  ;;  %v729_v41 = vmul.f32 %v1532_v39, %v1516_v12  ;;  %1491 = vmatprep.subr.mxu0 %v1545_v0 }
 0x201   :  { %v730_v43 = vmul.f32 %v1534_v40, %v1518_v13 }
 0x202   :  { %1479 = vmatmul.mubr.msk.f32.vlgmr.msra.gmra.mxu1 %vm744_vm4, %v729_v41 }
 0x203   :  { %v1536_v45 = vpop.eup %1535  ;;  %1484 = vmatmul.mubr.msk.f32.vlgmr.msra.gmra.mxu0 %vm744_vm4, %v730_v43  ;;  %1487 = vmatpush3.msk.msra.mxu1 %vm748_vm3, %v739_v42 }
 0x204   :  { %v1538_v46 = vpop.eup %1537  ;;  %1488 = vmatprep.mubr.msk.f32.mxu1 %vm1546_vm1, %v1545_v0  ;;  %1492 = vmatpush3.msk.msra.mxu0 %vm748_vm3, %v740_v44  ;;  %v731_v47 = vmul.f32 %v1536_v45, %v1520_v16 }
 0x205   :  { %1493 = vmatprep.mubr.msk.f32.mxu0 %vm1546_vm1, %v1545_v0  ;;  %v732_v49 = vmul.f32 %v1538_v46, %v1522_v17  ;;  %1496 = vmatprep.subr.mxu1 %v1545_v0 }
 0x206   :  { %1489 = vmatmul.mubr.msk.f32.vlgmr.msra.gmra.mxu1 %vm744_vm4, %v731_v47  ;;  %1501 = vmatprep.subr.mxu0 %v1545_v0 }
 0x207   :  { %v1540_v51 = vpop.eup %1539  ;;  %1494 = vmatmul.mubr.msk.f32.vlgmr.msra.gmra.mxu0 %vm744_vm4, %v732_v49  ;;  %1497 = vmatpush3.msk.msra.mxu1 %vm748_vm3, %v741_v48 }
 0x208   :  { %v1542_v52 = vpop.eup %1541  ;;  %1498 = vmatprep.mubr.msk.f32.mxu1 %vm1546_vm1, %v1545_v0  ;;  %1502 = vmatpush3.msk.msra.mxu0 %vm748_vm3, %v742_v50  ;;  %v733_v53 = vmul.f32 %v1540_v51, %v1674_v20 }
 0x209   :  { %1503 = vmatprep.mubr.msk.f32.mxu0 %vm1546_vm1, %v1545_v0  ;;  %v734_v55 = vmul.f32 %v1542_v52, %v1676_v21  ;;  %1506 = vmatprep.subr.mxu1 %v1545_v0 }
 0x20a   :  { %1499 = vmatmul.mubr.msk.f32.vlgmr.msra.gmra.mxu1 %vm744_vm4, %v733_v53 }
 0x20b   :  { %v1544_v56 = vpop.eup %1543  ;;  %1504 = vmatmul.mubr.msk.f32.vlgmr.msra.gmra.mxu0 %vm744_vm4, %v734_v55  ;;  %1507 = vmatpush3.msk.msra.mxu1 %vm748_vm3, %v743_v54 }
 0x20c   :  { %1508 = vmatprep.mubr.msk.f32.mxu1 %vm1546_vm1, %v1545_v0  ;;  %v735_v57 = vmul.f32 %v1544_v56, %v1682_v24 }
 0x20e   :  { %1509 = vmatmul.mubr.msk.f32.vlgmr.msra.gmra.mxu1 %vm744_vm4, %v735_v57 }
 0x2be   :  { %v818_v58 = vpop.f32.mrf.mxu0 }
 0x2bf   :  { %1355 = vst.msk [vmem:[%s1782_s3] sm:$0x1f] %vm1354_vm5, %v818_v58 }
 0x2c0   :  { %v1475_v59 = vpop.f32.mrf.mxu0 }
 0x2c2   :  { %v894_v60 = vpop.f32.mrf.mxu1 }
 0x2c3   :  { %1356 = vst.msk [vmem:[%s1782_s3 + $0x8] sm:$0x1f] %vm1354_vm5, %v894_v60  ;;  %v970_v61 = vpop.f32.mrf.mxu0 }
 0x2c4   :  { %1357 = vst.msk [vmem:[%s1782_s3 + $0x10] sm:$0x1f] %vm1354_vm5, %v970_v61  ;;  %v1480_v0 = vpop.f32.mrf.mxu1 }
 0x2c5   :  { %v1485_v62 = vpop.f32.mrf.mxu0 }
 0x2c6   :  { %v1046_v63 = vpop.f32.mrf.mxu1 }
 0x2c7   :  { %1358 = vst.msk [vmem:[%s1782_s3 + $0x18] sm:$0x1f] %vm1354_vm5, %v1046_v63  ;;  %v1122_v1 = vpop.f32.mrf.mxu0 }
 0x2c8   :  { %1359 = vst.msk [vmem:[%s1782_s3 + $0x20] sm:$0x1f] %vm1354_vm5, %v1122_v1  ;;  %v1490_v2 = vpop.f32.mrf.mxu1 }
 0x2c9   :  { %v1495_v3 = vpop.f32.mrf.mxu0 }
 0x2ca   :  { %v1198_v4 = vpop.f32.mrf.mxu1 }
 0x2cb   :  { %1360 = vst.msk [vmem:[%s1782_s3 + $0x28] sm:$0x1f] %vm1354_vm5, %v1198_v4  ;;  %v1274_v5 = vpop.f32.mrf.mxu0 }
 0x2cc   :  { %1361 = vst.msk [vmem:[%s1782_s3 + $0x30] sm:$0x1f] %vm1354_vm5, %v1274_v5  ;;  %v1500_v6 = vpop.f32.mrf.mxu1 }
 0x2cd   :  { %v1505_v7 = vpop.f32.mrf.mxu0 }
 0x2ce   :  { %v1350_v8 = vpop.f32.mrf.mxu1 }
 0x2cf   :  { %1362 = vst.msk [vmem:[%s1782_s3 + $0x38] sm:$0x1f] %vm1354_vm5, %v1350_v8 }
 0x2d0   :  { %v1510_v9 = vpop.f32.mrf.mxu1 }

// kernel: vision_transformer_forward.17
= control target key start
LH: loop header
LB: loop body
LE: loop exit
PB: predicated region body
PF: predicated region fallthrough
CT: control target
= control target key end

     0   :  { %vm21_vm0 = vcmask 261120   ;;  %vm23_vm1 = vcmask 254976   ;;  %v165_v2 = vmov 0.0   ;;  %s232_s1 = inlined_call_operand.vmem [shape: f32[32,32], index: 1, kind: input, shape index: {}]   ;;  %s233_s0 = inlined_call_operand.vmem [shape: f32[10,32], index: 0, kind: input, shape index: {}]   ;;  %s234_s2 = inlined_call_operand.vmem [shape: f32[1,32], index: 2, kind: input, shape index: {}]   ;;  %s235_s3 = inlined_call_operand.vmem [shape: f32[10,32], index: 3, kind: input, shape index: {}]   ;;  %s236_s4 = inlined_call_operand.vmem [shape: f32[10,32], index: 4, kind: output, shape index: {}]  }
   0x1   :  { %v32_v0 = vld [vmem:[%s232_s1 + $0x18] sm:$0xff]  ;;  %v31_v1 = vld [vmem:[%s232_s1 + $0x10] sm:$0xff]  ;;  %24 = vst.msk [vmem:[#allocation2 + $0x8] sm:$0x3] %vm23_vm1, %v165_v2  ;;  %v27_v3 = vld [vmem:[%s233_s0] sm:$0xff] }
   0x2   :  { %22 = vst.msk [vmem:[#allocation2] sm:$0xff] %vm21_vm0, %v165_v2  ;;  %153 = vmatprep.subr.mxu0 %v32_v0  ;;  %v30_v4 = vld [vmem:[%s232_s1 + $0x8] sm:$0xff]  ;;  %161 = vmatprep.mubr.msk.f32.mxu0 %vm21_vm0, %v27_v3  ;;  %v29_v5 = vld [vmem:[%s232_s1] sm:$0xff] }
   0x3   :  { %154 = vmatpush3.msra.mxu0 %v32_v0  ;;  %v28_v6 = vld [vmem:[%s233_s0 + $0x8] sm:$0x3]  ;;  %v146_v13 = vld [vmem:[%s234_s2] ss:$0 sm:$0xff] }
   0x4   :  { %155 = vmatprep.subr.mxu0 %v31_v1  ;;  %v135_v15 = vld [vmem:[%s235_s3 + $0x8] sm:$0x3]  ;;  %v134_v17 = vld [vmem:[%s235_s3] sm:$0xff] }
   0x5   :  { %156 = vmatpush3.msra.mxu0 %v31_v1 }
   0x6   :  { %157 = vmatprep.subr.mxu0 %v30_v4 }
   0x7   :  { %158 = vmatpush3.msra.mxu0 %v30_v4 }
   0x8   :  { %159 = vmatprep.subr.mxu0 %v29_v5  ;;  %v26_v7 = vld [vmem:[#allocation2 + $0x8] sm:$0x3] }
   0x9   :  { %160 = vmatpush3.msra.mxu0 %v29_v5  ;;  %v25_v9 = vld [vmem:[#allocation2] sm:$0xff] }
   0xa   :  { %162 = vmatmul.mubr.msk.f32.vlgmr.msra.gmra.mxu0 %vm21_vm0, %v28_v6 }
  0xca   :  { %v163_v8 = vpop.f32.mrf.mxu0 }
  0xcb   :  { %v116_v10 = vadd.f32 %v163_v8, %v26_v7 }
  0xcc   :  { %v106_v11 = vpop.f32.mrf.mxu0 }
  0xcd   :  { %119 = vst.msk [vmem:[#allocation2 + $0x8] sm:$0x3] %vm23_vm1, %v116_v10  ;;  %v115_v12 = vadd.f32 %v106_v11, %v25_v9 }
  0xcf   :  { %117 = vst.msk [vmem:[#allocation2] sm:$0xff] %vm21_vm0, %v115_v12 }
  0xd4   :  { %v124_v14 = vld [vmem:[#allocation2 + $0x8] sm:$0x3] }
  0xd5   :  { %v133_v16 = vadd.f32 %v146_v13, %v124_v14 }
  0xd6   :  { %v123_v18 = vld [vmem:[#allocation2] sm:$0xff] }
  0xd7   :  { %v137_v19 = vadd.f32 %v135_v15, %v133_v16  ;;  %v132_v20 = vadd.f32 %v146_v13, %v123_v18 }
  0xd9   :  { %139 = vst.msk [vmem:[%s236_s4 + $0x8] sm:$0x3] %vm23_vm1, %v137_v19  ;;  %v136_v21 = vadd.f32 %v134_v17, %v132_v20 }
  0xdb   :  { %138 = vst.msk [vmem:[%s236_s4] sm:$0xff] %vm21_vm0, %v136_v21 }

// kernel: vision_transformer_forward.19
= control target key start
LH: loop header
LB: loop body
LE: loop exit
PB: predicated region body
PF: predicated region fallthrough
CT: control target
= control target key end

     0   :  { %vm23_vm0 = vcmask 254976   ;;  %v205_v2 = vmov 0.0   ;;  %vm21_vm1 = vcmask 261120   ;;  %s306_s1 = inlined_call_operand.vmem [shape: f32[128,32], index: 1, kind: input, shape index: {}]   ;;  %s307_s0 = inlined_call_operand.vmem [shape: f32[10,128], index: 0, kind: input, shape index: {}]   ;;  %s308_s2 = inlined_call_operand.vmem [shape: f32[1,32], index: 2, kind: input, shape index: {}]   ;;  %s309_s3 = inlined_call_operand.vmem [shape: f32[10,32], index: 3, kind: input, shape index: {}]   ;;  %s310_s4 = inlined_call_operand.vmem [shape: f32[10,32], index: 4, kind: output, shape index: {}]  }
   0x1   :  { %v44_v0 = vld [vmem:[%s306_s1 + $0x78] sm:$0xff]  ;;  %v43_v1 = vld [vmem:[%s306_s1 + $0x70] sm:$0xff]  ;;  %24 = vst.msk [vmem:[#allocation2 + $0x8] sm:$0x3] %vm23_vm0, %v205_v2  ;;  %v42_v3 = vld [vmem:[%s306_s1 + $0x68] sm:$0xff] }
   0x2   :  { %169 = vmatprep.subr.mxu0 %v44_v0  ;;  %v41_v4 = vld [vmem:[%s306_s1 + $0x60] sm:$0xff]  ;;  %v40_v6 = vld [vmem:[%s306_s1 + $0x58] sm:$0xff]  ;;  %v39_v7 = vld [vmem:[%s306_s1 + $0x50] sm:$0xff]  ;;  %22 = vst.msk [vmem:[#allocation2] sm:$0xff] %vm21_vm1, %v205_v2 }
   0x3   :  { %170 = vmatpush3.msra.mxu0 %v44_v0  ;;  %v27_v5 = vld [vmem:[%s307_s0] sm:$0xff]  ;;  %v38_v8 = vld [vmem:[%s306_s1 + $0x48] sm:$0xff]  ;;  %v36_v10 = vld [vmem:[%s306_s1 + $0x38] sm:$0xff] }
   0x4   :  { %171 = vmatprep.subr.mxu0 %v43_v1  ;;  %201 = vmatprep.mubr.f32.mxu0 %v27_v5  ;;  %v37_v9 = vld [vmem:[%s306_s1 + $0x40] sm:$0xff]  ;;  %v35_v11 = vld [vmem:[%s306_s1 + $0x30] sm:$0xff]  ;;  %v34_v12 = vld [vmem:[%s306_s1 + $0x28] sm:$0xff] }
   0x5   :  { %172 = vmatpush3.msra.mxu0 %v43_v1  ;;  %v33_v13 = vld [vmem:[%s306_s1 + $0x20] sm:$0xff]  ;;  %v32_v14 = vld [vmem:[%s306_s1 + $0x18] sm:$0xff]  ;;  %v31_v15 = vld [vmem:[%s306_s1 + $0x10] sm:$0xff] }
   0x6   :  { %173 = vmatprep.subr.mxu0 %v42_v3  ;;  %v30_v16 = vld [vmem:[%s306_s1 + $0x8] sm:$0xff]  ;;  %v29_v17 = vld [vmem:[%s306_s1] sm:$0xff] }
   0x7   :  { %174 = vmatpush3.msra.mxu0 %v42_v3  ;;  %v28_v18 = vld [vmem:[%s307_s0 + $0x8] sm:$0x3]  ;;  %v150_v25 = vld [vmem:[%s308_s2] ss:$0 sm:$0xff] }
   0x8   :  { %175 = vmatprep.subr.mxu0 %v41_v4  ;;  %v26_v19 = vld [vmem:[#allocation2 + $0x8] sm:$0x3]  ;;  %v140_v30 = vld [vmem:[%s309_s3] sm:$0xff] }
   0x9   :  { %176 = vmatpush3.msra.mxu0 %v41_v4  ;;  %v25_v21 = vld [vmem:[#allocation2] sm:$0xff]  ;;  %v141_v27 = vld [vmem:[%s309_s3 + $0x8] sm:$0x3] }
   0xa   :  { %177 = vmatprep.subr.mxu0 %v40_v6 }
   0xb   :  { %178 = vmatpush3.msra.mxu0 %v40_v6 }
   0xc   :  { %179 = vmatprep.subr.mxu0 %v39_v7 }
   0xd   :  { %180 = vmatpush3.msra.mxu0 %v39_v7 }
   0xe   :  { %181 = vmatprep.subr.mxu0 %v38_v8 }
   0xf   :  { %182 = vmatpush3.msra.mxu0 %v38_v8 }
  0x10   :  { %183 = vmatprep.subr.mxu0 %v37_v9 }
  0x11   :  { %184 = vmatpush3.msra.mxu0 %v37_v9 }
  0x12   :  { %185 = vmatprep.subr.mxu0 %v36_v10 }
  0x13   :  { %186 = vmatpush3.msra.mxu0 %v36_v10 }
  0x14   :  { %187 = vmatprep.subr.mxu0 %v35_v11 }
  0x15   :  { %188 = vmatpush3.msra.mxu0 %v35_v11 }
  0x16   :  { %189 = vmatprep.subr.mxu0 %v34_v12 }
  0x17   :  { %190 = vmatpush3.msra.mxu0 %v34_v12 }
  0x18   :  { %191 = vmatprep.subr.mxu0 %v33_v13 }
  0x19   :  { %192 = vmatpush3.msra.mxu0 %v33_v13 }
  0x1a   :  { %193 = vmatprep.subr.mxu0 %v32_v14 }
  0x1b   :  { %194 = vmatpush3.msra.mxu0 %v32_v14 }
  0x1c   :  { %195 = vmatprep.subr.mxu0 %v31_v15 }
  0x1d   :  { %196 = vmatpush3.msra.mxu0 %v31_v15 }
  0x1e   :  { %197 = vmatprep.subr.mxu0 %v30_v16 }
  0x1f   :  { %198 = vmatpush3.msra.mxu0 %v30_v16 }
  0x20   :  { %199 = vmatprep.subr.mxu0 %v29_v17 }
  0x21   :  { %200 = vmatpush3.msra.mxu0 %v29_v17 }
  0x22   :  { %202 = vmatmul.mubr.f32.vlgmr.msra.gmra.mxu0 %v28_v18 }
  0xe2   :  { %v203_v20 = vpop.f32.mrf.mxu0 }
  0xe3   :  { %v121_v22 = vadd.f32 %v203_v20, %v26_v19 }
  0xe4   :  { %v111_v23 = vpop.f32.mrf.mxu0 }
  0xe5   :  { %125 = vst.msk [vmem:[#allocation2 + $0x8] sm:$0x3] %vm23_vm0, %v121_v22  ;;  %v120_v24 = vadd.f32 %v111_v23, %v25_v21 }
  0xe7   :  { %123 = vst.msk [vmem:[#allocation2] sm:$0xff] %vm21_vm1, %v120_v24 }
  0xec   :  { %v130_v26 = vld [vmem:[#allocation2 + $0x8] sm:$0x3] }
  0xed   :  { %v139_v28 = vadd.f32 %v150_v25, %v130_v26 }
  0xee   :  { %v129_v29 = vld [vmem:[#allocation2] sm:$0xff] }
  0xef   :  { %v143_v31 = vadd.f32 %v141_v27, %v139_v28  ;;  %v138_v32 = vadd.f32 %v150_v25, %v129_v29 }
  0xf1   :  { %145 = vst.msk [vmem:[%s310_s4 + $0x8] sm:$0x3] %vm23_vm0, %v143_v31  ;;  %v142_v33 = vadd.f32 %v140_v30, %v138_v32 }
  0xf3   :  { %144 = vst.msk [vmem:[%s310_s4] sm:$0xff] %vm21_vm1, %v142_v33 }

// kernel: vision_transformer_forward.18
= control target key start
LH: loop header
LB: loop body
LE: loop exit
PB: predicated region body
PF: predicated region fallthrough
CT: control target
= control target key end

     0   :  { %vm22_vm0 = vcmask 261120   ;;  %vm26_vm1 = vcmask 254976   ;;  %s286_s0 = inlined_call_operand.vmem [shape: f32[10,32], index: 0, kind: input, shape index: {}]   ;;  %s287_s3 = inlined_call_operand.vmem [shape: f32[32,128], index: 3, kind: input, shape index: {}]   ;;  %s288_s1 = inlined_call_operand.vmem [shape: f32[1,32], index: 1, kind: input, shape index: {}]   ;;  %s289_s2 = inlined_call_operand.vmem [shape: f32[1,32], index: 2, kind: input, shape index: {}]   ;;  %s290_s4 = inlined_call_operand.vmem [shape: f32[1,128], index: 4, kind: input, shape index: {}]   ;;  %s291_s5 = inlined_call_operand.vmem [shape: f32[10,128], index: 5, kind: output, shape index: {}]  }
   0x1   :  { %v20_v0 = vld [vmem:[%s286_s0] sm:$0xff]  ;;  %v21_v1 = vld [vmem:[%s286_s0 + $0x8] sm:$0x3]  ;;  %v72_v14 = vld [vmem:[%s287_s3 + $0x18] sm:$0xff] }
   0x2   :  { %v23_v2 = vsel %vm22_vm0, %v20_v0, 0.0  ;;  %v27_v3 = vsel %vm26_vm1, %v21_v1, 0.0  ;;  %v71_v15 = vld [vmem:[%s287_s3 + $0x10] sm:$0xff]  ;;  %196 = vmatprep.subr.mxu0 %v72_v14  ;;  %v70_v16 = vld [vmem:[%s287_s3 + $0x8] sm:$0xff]  ;;  %v69_v17 = vld [vmem:[%s287_s3] sm:$0xff] }
   0x3   :  { %24 = vadd.xlane.f32.xlu0 %v23_v2  ;;  %197 = vmatpush3.msra.mxu0 %v72_v14  ;;  %v183_v25 = vld [vmem:[%s288_s1] ss:$0 sm:$0xff] }
   0x4   :  { %198 = vmatprep.subr.mxu0 %v71_v15  ;;  %v184_v27 = vld [vmem:[%s289_s2] ss:$0 sm:$0xff] }
   0x5   :  { %199 = vmatpush3.msra.mxu0 %v71_v15  ;;  %v185_v34 = vld [vmem:[%s290_s4] ss:$0 sm:$0xff] }
   0x6   :  { %200 = vmatprep.subr.mxu0 %v70_v16 }
   0x7   :  { %28 = vadd.xlane.f32.xlu0 %v27_v3  ;;  %201 = vmatpush3.msra.mxu0 %v70_v16 }
   0x8   :  { %202 = vmatprep.subr.mxu0 %v69_v17 }
   0x9   :  { %203 = vmatpush3.msra.mxu0 %v69_v17 }
  0x8c   :  { %v25_v4 = vpop.xlane.xlu0 %24 }
  0x8d   :  { %v31_v5 = vmul.f32 0.03125, %v25_v4 }
  0x8f   :  { %v33_v6 = vsub.f32 %v20_v0, %v31_v5 }
  0x90   :  { %v29_v7 = vpop.xlane.xlu0 %28 }
  0x91   :  { %v32_v8 = vmul.f32 0.03125, %v29_v7  ;;  %v35_v9 = vmul.f32 %v33_v6, %v33_v6 }
  0x93   :  { %v34_v10 = vsub.f32 %v21_v1, %v32_v8  ;;  %v37_v11 = vsel %vm22_vm0, %v35_v9, 0.0 }
  0x94   :  { %38 = vadd.xlane.f32.xlu1 %v37_v11 }
  0x95   :  { %v36_v12 = vmul.f32 %v34_v10, %v34_v10 }
  0x97   :  { %v40_v13 = vsel %vm26_vm1, %v36_v12, 0.0 }
  0x98   :  { %41 = vadd.xlane.f32.xlu1 %v40_v13 }
 0x11d   :  { %v39_v18 = vpop.xlane.xlu1 %38 }
 0x11e   :  { %v43_v19 = vmul.f32 0.03125, %v39_v18 }
 0x120   :  { %v45_v20 = vadd.f32 1e-05, %v43_v19 }
 0x121   :  { %v42_v21 = vpop.xlane.xlu1 %41 }
 0x122   :  { %207 = vrsqrt.f32 %v45_v20  ;;  %v44_v22 = vmul.f32 0.03125, %v42_v21 }
 0x124   :  { %v46_v23 = vadd.f32 1e-05, %v44_v22 }
 0x126   :  { %209 = vrsqrt.f32 %v46_v23 }
 0x12f   :  { %v208_v24 = vpop.eup %207 }
 0x130   :  { %v49_v26 = vmul.f32 %v208_v24, %v33_v6 }
 0x132   :  { %v58_v28 = vmul.f32 %v183_v25, %v49_v26 }
 0x133   :  { %v210_v29 = vpop.eup %209 }
 0x134   :  { %v50_v30 = vmul.f32 %v210_v29, %v34_v10  ;;  %v67_v31 = vadd.f32 %v184_v27, %v58_v28 }
 0x136   :  { %v59_v32 = vmul.f32 %v183_v25, %v50_v30  ;;  %204 = vmatprep.mubr.msk.f32.mxu0 %vm22_vm0, %v67_v31 }
 0x138   :  { %v68_v33 = vadd.f32 %v184_v27, %v59_v32 }
 0x13a   :  { %205 = vmatmul.mubr.msk.f32.vlgmr.msra.gmra.mxu0 %vm22_vm0, %v68_v33 }
 0x1fa   :  { %v206_v35 = vpop.f32.mrf.mxu0 }
 0x1fb   :  { %v158_v36 = vadd.f32 %v206_v35, %v185_v34 }
 0x1fc   :  { %v152_v37 = vpop.f32.mrf.mxu0 }
 0x1fd   :  { %v189_v38 = vmul.f32 -1.702, %v158_v36  ;;  %v153_v39 = vadd.f32 %v185_v34, %v152_v37 }
 0x1ff   :  { %v167_v40 = vmul.f32 1.442695, %v189_v38  ;;  %v188_v41 = vmul.f32 -1.702, %v153_v39 }
 0x201   :  { %211 = vpow2.f32 %v167_v40  ;;  %v165_v42 = vmul.f32 1.442695, %v188_v41 }
 0x203   :  { %213 = vpow2.f32 %v165_v42 }
 0x20e   :  { %v212_v43 = vpop.eup %211 }
 0x20f   :  { %v170_v44 = vadd.f32 1.0, %v212_v43 }
 0x210   :  { %v214_v45 = vpop.eup %213 }
 0x211   :  { %215 = vrcp.f32 %v170_v44  ;;  %v169_v46 = vadd.f32 1.0, %v214_v45 }
 0x213   :  { %217 = vrcp.f32 %v169_v46 }
 0x21e   :  { %v216_v47 = vpop.eup %215 }
 0x21f   :  { %v176_v48 = vmul.f32 %v216_v47, %v158_v36 }
 0x220   :  { %v218_v49 = vpop.eup %217 }
 0x221   :  { %178 = vst [vmem:[%s291_s5 + $0x8] sm:$0x3] %v176_v48  ;;  %v175_v50 = vmul.f32 %v218_v49, %v153_v39 }
 0x223   :  { %177 = vst [vmem:[%s291_s5] sm:$0xff] %v175_v50 }

// kernel: vision_transformer_forward.25
= control target key start
LH: loop header
LB: loop body
LE: loop exit
PB: predicated region body
PF: predicated region fallthrough
CT: control target
= control target key end

     0   :  { %vm22_vm0 = vcmask 254976   ;;  %s261_s0 = inlined_call_operand.vmem [shape: f32[2,32], index: 0, kind: input, shape index: {}]   ;;  %s262_s1 = inlined_call_operand.vmem [shape: f32[1,32], index: 1, kind: input, shape index: {}]   ;;  %s263_s2 = inlined_call_operand.vmem [shape: f32[1,32], index: 2, kind: input, shape index: {}]   ;;  %s264_s3 = inlined_call_operand.vmem [shape: f32[32,16], index: 3, kind: input, shape index: {}]   ;;  %s265_s4 = inlined_call_operand.vmem [shape: f32[1,16], index: 4, kind: input, shape index: {}]   ;;  %s266_s5 = inlined_call_operand.hbm [shape: f32[2,16], index: 5, kind: output, shape index: {}]  }
   0x1   :  { %v21_v0 = vld [vmem:[%s261_s0] sm:$0x3] }
   0x2   :  { %10 = vsyncpa [#allocation3], 0  ;;  %v23_v1 = vsel %vm22_vm0, %v21_v0, 0.0  ;;  %v56_v7 = vld [vmem:[%s264_s3 + $0x18] sm:$0xff]  ;;  %v201_v8 = vmov 0.0   ;;  %v55_v9 = vld [vmem:[%s264_s3 + $0x10] sm:$0xff] }
   0x3   :  { %24 = vadd.xlane.f32.xlu0 %v23_v1  ;;  %163 = vmatprep.subr.mxu0 %v201_v8  ;;  %vm202_vm1 = vmmov 0   ;;  %v54_v10 = vld [vmem:[%s264_s3 + $0x8] sm:$0xff]  ;;  %v53_v11 = vld [vmem:[%s264_s3] sm:$0xff]  ;;  %vm64_vm2 = vcmask 261120   ;;  %s203_s7 = smov [#allocation2]   ;;  %vm138_vm3 = vcmask 123904  }
   0x4   :  { %171 = vmatprep.mubr.msk.f32.mxu0 %vm202_vm1, %v201_v8  ;;  %164 = vmatpush3.msra.mxu0 %v56_v7  ;;  %v154_v16 = vld [vmem:[%s262_s1] ss:$0 sm:$0xff]  ;;  %s146_s8 = sshll.u32 %s203_s7, 4  ;;  %s147_s8 = int_to_ptr.vmem [resolvable:$true] %s146_s8 }
   0x5   :  { %165 = vmatprep.subr.mxu0 %v201_v8  ;;  %v155_v18 = vld [vmem:[%s263_s2] ss:$0 sm:$0xff]  ;;  %s179_s1 = scalar_lea.vmem %s147_s8, 32  ;;  %p184_p1 = scmp.lt.s32.totalorder %s147_s8, %s147_s8 }
   0x6   :  { %166 = vmatpush3.msra.mxu0 %v55_v9  ;;  %v156_v21 = vld [vmem:[%s265_s4] ss:$0 sm:$0xff]  ;;  %p180_p0 = scmp.ne.s32.totalorder %s147_s8, %s179_s1  ;;  %p185_p2 = scmp.lt.s32.totalorder %s179_s1, %s179_s1 }
   0x7   :  { %167 = vmatprep.subr.mxu0 %v201_v8 }
   0x8   :  { %168 = vmatpush3.msra.mxu0 %v54_v10  ;;  %p186_p3 = por %p185_p2, %p184_p1 }
   0x9   :  { %169 = vmatprep.subr.mxu0 %v201_v8 }
   0xa   :  { %170 = vmatpush3.msra.mxu0 %v53_v11  ;;  %p187_p4 = pnand %p186_p3, %p180_p0 }
  0x8c   :  { %v25_v2 = vpop.xlane.xlu0 %24 }
  0x8d   :  { %v27_v3 = vmul.f32 0.03125, %v25_v2 }
  0x8f   :  { %v28_v4 = vsub.f32 %v21_v0, %v27_v3 }
  0x91   :  { %v29_v5 = vmul.f32 %v28_v4, %v28_v4 }
  0x93   :  { %v30_v6 = vsel %vm22_vm0, %v29_v5, 0.0 }
  0x94   :  { %31 = vadd.xlane.f32.xlu0 %v30_v6 }
 0x11d   :  { %v32_v12 = vpop.xlane.xlu0 %31 }
 0x11e   :  { %v33_v13 = vmul.f32 0.03125, %v32_v12 }
 0x120   :  { %v34_v14 = vadd.f32 1e-05, %v33_v13 }
 0x122   :  { %177 = vrsqrt.f32 %v34_v14 }
 0x12f   :  { %v178_v15 = vpop.eup %177 }
 0x130   :  { %v36_v17 = vmul.f32 %v178_v15, %v28_v4 }
 0x132   :  { %v44_v19 = vmul.f32 %v154_v16, %v36_v17 }
 0x134   :  { %v52_v20 = vadd.f32 %v155_v18, %v44_v19 }
 0x136   :  { %172 = vmatmul.mubr.msk.f32.vlgmr.msra.gmra.mxu0 %vm64_vm2, %v52_v20 }
 0x1f6   :  { %v134_v22 = vpop.f32.mrf.mxu0 }
 0x1f7   :  { %v135_v23 = vadd.f32 %v156_v21, %v134_v22 }
 0x1f8   :  { %v173_v24 = vpop.f32.mrf.mxu0 }
 0x1f9   :  { %139 = vst.msk [vmem:[#allocation2] sm:$0x3] %vm138_vm3, %v135_v23 }
 0x1fa   :  { %190 = shalt.err (!%p187_p4)
}
 0x1fb   :  { %149 = dma.vmem_to_hbm [thread:$0]  %s147_s8, 32, %s266_s5, [#allocation3]  }
 0x1fc   :  { %199 = dma.done.wait [#allocation3], 32  }
 0x1fd   :  { %200 = vsyncadd [#allocation3], 4294967264 }
 0x1fe   :  { %153 = vsyncpa [#allocation3], 1 }

</bundles_post_ra>
